<compile_context>
chip_gen: v5e
topology: v5e:2x2
jax: 0.10.0
libtpu: 0.0.40
codegen_flags: <defaults>
</compile_context>

<pallas_src>
import functools

import jax
import jax.numpy as jnp
from jax import lax
from jax.experimental import pallas as pl
from jax.experimental.pallas import tpu as pltpu


def _vmem_capacity_bytes(default_bytes=64 << 20):
    """Physical VMEM per core (128 MiB v5e/v6e, 64 MiB v7x)."""
    try:
        return int(pltpu.get_tpu_info().vmem_capacity_bytes)
    except Exception:
        return default_bytes  # fall back to the smallest generation


def _make_lstmnn_kernel(num_layers, seq_len, batch_pad, hidden, mxu_dtype):
    L, T, Bp, H = num_layers, seq_len, batch_pad, hidden
    n_steps = T + L - 1                      # wavefront length (was L*T in v1)
    unroll = True if n_steps <= 32 else 4

    def kernel(gx0_ref, w_big_ref, b_big_ref, w_fc_ref, b_fc_ref, out_ref):
        # Fused block-banded recurrent weight (L*H, L*4H); tiny at H=32 so it
        # lives in vregs across the unrolled loop.
        # TODO(synk): for H >= 128, read K-tiles of w_big from the VMEM ref
        # inside the step instead of hoisting (an f32 weight alone would fill
        # the 64-vreg file), and permute gate columns to [i, f, o, g] so the
        # per-step EUP work drops from 9H to 5H per layer.
        w_big = w_big_ref[...]
        b_big = b_big_ref[...]

        def wstep(s, carry):
            hs, cs = carry                   # tuples of L arrays, each (Bp, H)
            h_cat = hs[0] if L == 1 else jnp.concatenate(hs, axis=1)
            # One fused MXU call: every layer's recurrent + cross-layer gate
            # contribution, N = L*4H wide.  Only the matmul operands are cast
            # to mxu_dtype; accumulation and all elementwise math stay f32.
            pre = jnp.dot(h_cat.astype(mxu_dtype), w_big,
                          preferred_element_type=jnp.float32) + b_big
            t0 = jnp.minimum(s, T - 1)       # clamp; result masked when s >= T
            g0_add = gx0_ref[t0]             # (Bp, 4H) precomputed x @ W_ih0^T

            new_hs, new_cs = [], []
            for l in range(L):               # static Python loop over layers
                g = pre[:, l * 4 * H:(l + 1) * 4 * H]
                if l == 0:
                    g = g + g0_add
                # PyTorch gate order [i, f, g, o]; two full-width EUP passes.
                sig = jax.nn.sigmoid(g)
                tnh = jnp.tanh(g)
                i_g = sig[:, 0 * H:1 * H]
                f_g = sig[:, 1 * H:2 * H]
                g_g = tnh[:, 2 * H:3 * H]
                o_g = sig[:, 3 * H:4 * H]
                c_new = f_g * cs[l] + i_g * g_g
                h_new = o_g * jnp.tanh(c_new)
                # Layer l is active for 0 <= s - l < T; outside that window it
                # holds its last state (exactly what hn needs).
                if l == 0:
                    active = s < T
                else:
                    active = jnp.logical_and(s >= l, s < T + l)
                new_hs.append(jnp.where(active, h_new, hs[l]))
                new_cs.append(jnp.where(active, c_new, cs[l]))
            return (tuple(new_hs), tuple(new_cs))

        zeros = tuple(jnp.zeros((Bp, H), jnp.float32) for _ in range(L))
        hs, _cs = lax.fori_loop(0, n_steps, wstep, (zeros, zeros),
                                unroll=unroll)

        # hn[-1] -> fc_final  (f32, matching hn[-1].float() in the module).
        final = (jnp.dot(hs[L - 1], w_fc_ref[...],
                         preferred_element_type=jnp.float32) + b_fc_ref[...])
        out_ref[...] = final.astype(out_ref.dtype)

    return kernel


def lstmnn_forward(x, weights, hidden_size, output_size,
                   mxu_dtype=jnp.float32):
    """x: (B, T, D_in) batch-first.  Returns (B, output_size) float32.

    mxu_dtype: dtype of the in-kernel recurrent matmul operands.  Use
    jnp.bfloat16 on v6e/v7x to shorten the serial per-step MXU latency;
    f32 (default) keeps the result within 1e-3 of the f32 reference.
    """
    B, T, D_in = x.shape
    H = hidden_size
    O = output_size
    L = len(weights["w_ih"])
    Bp = ((B + 7) // 8) * 8                              # f32 sublane multiple

    # ---- Layer-0 input projection as one full-efficiency XLA matmul --------
    x_tm = jnp.transpose(x.astype(jnp.float32), (1, 0, 2))   # (T, B, D_in)
    if Bp != B:
        x_tm = jnp.pad(x_tm, ((0, 0), (0, Bp - B), (0, 0)))
    w_ih0 = weights["w_ih"][0].astype(jnp.float32)            # (4H, D_in)
    # Contract x_tm dim 2 with w_ih0 dim 1 -> (T, Bp, 4H); no W^T materialized.
    gx0 = lax.dot_general(x_tm, w_ih0,
                          dimension_numbers=(((2,), (1,)), ((), ())))

    # ---- Fused block-banded recurrent weight (L*H, L*4H) + fused bias ------
    #   row-block l   -> col-block l : W_hh_l^T   (recurrent term of layer l)
    #   row-block l-1 -> col-block l : W_ih_l^T   (cross-layer input, l > 0)
    w_big = jnp.zeros((L * H, L * 4 * H), jnp.float32)
    for l in range(L):
        w_big = w_big.at[l * H:(l + 1) * H, l * 4 * H:(l + 1) * 4 * H].set(
            weights["w_hh"][l].astype(jnp.float32).T)
        if l > 0:
            w_big = w_big.at[(l - 1) * H:l * H, l * 4 * H:(l + 1) * 4 * H].set(
                weights["w_ih"][l].astype(jnp.float32).T)
    b_big = jnp.concatenate(
        [(weights["b_ih"][l] + weights["b_hh"][l]).astype(jnp.float32)
         for l in range(L)]).reshape(1, L * 4 * H)

    inputs = [
        gx0,                                             # (T, Bp, 4H) f32
        w_big.astype(mxu_dtype),                         # (L*H, L*4H)
        b_big,                                           # (1, L*4H)  f32
        weights["w_fc"].astype(jnp.float32).T,           # (H, O)
        weights["b_fc"].astype(jnp.float32).reshape(1, O),
    ]

    # ---- Generation-aware VMEM limit ---------------------------------------
    resident = (sum(int(a.size) * int(a.dtype.itemsize) for a in inputs)
                + Bp * O * 4)
    cap = _vmem_capacity_bytes()
    vmem_limit = min(max(resident + (16 << 20), 32 << 20), cap - (8 << 20))

    # TODO(synk): for long T, keep gx0 in HBM (memory_space=pl.ANY) and
    # double-buffer T-chunks into VMEM with pltpu.make_async_copy; the DMA
    # hides trivially under the latency-bound recurrence.
    # TODO(synk): on v7x (2 TensorCores) add a parallel grid axis over batch
    # blocks (dimension_semantics=("parallel",)) when B is large.

    kernel = _make_lstmnn_kernel(L, T, Bp, H, mxu_dtype)
    vmem_spec = functools.partial(pl.BlockSpec,
                                  memory_space=pltpu.MemorySpace.VMEM)

    out = pl.pallas_call(
        kernel,
        out_shape=jax.ShapeDtypeStruct((Bp, O), jnp.float32),
        in_specs=[vmem_spec() for _ in inputs],
        out_specs=vmem_spec(),
        compiler_params=pltpu.CompilerParams(vmem_limit_bytes=int(vmem_limit)),
    )(*inputs)
    return out[:B]


def _ref_forward(x, weights, hidden_size):
    """Pure-JAX reference (same math as nn.LSTM + nn.Linear, float32)."""
    B, T, _ = x.shape
    H = hidden_size
    inp = x.astype(jnp.float32)
    h = None
    for l in range(len(weights["w_ih"])):
        wih = weights["w_ih"][l]
        whh = weights["w_hh"][l]
        b = weights["b_ih"][l] + weights["b_hh"][l]
        h = jnp.zeros((B, H), jnp.float32)
        c = jnp.zeros((B, H), jnp.float32)
        outs = []
        for t in range(T):
            gates = inp[:, t, :] @ wih.T + h @ whh.T + b
            i_g = jax.nn.sigmoid(gates[:, :H])
            f_g = jax.nn.sigmoid(gates[:, H:2 * H])
            g_g = jnp.tanh(gates[:, 2 * H:3 * H])
            o_g = jax.nn.sigmoid(gates[:, 3 * H:])
            c = f_g * c + i_g * g_g
            h = o_g * jnp.tanh(c)
            outs.append(h)
        inp = jnp.stack(outs, axis=1)
    return h @ weights["w_fc"].T + weights["b_fc"]


if __name__ == "__main__":
    # lstm_params = dict(input_size=8, hidden_size=32, num_layers=2), output_size=4
    B, T, D_IN, H, L, O = 2, 8, 8, 32, 2, 4

    key = jax.random.PRNGKey(0)
    k = 1.0 / jnp.sqrt(H)  # PyTorch default uniform(-1/sqrt(H), 1/sqrt(H))

    weights = {"w_ih": [], "w_hh": [], "b_ih": [], "b_hh": []}
    for l in range(L):
        d_in_l = D_IN if l == 0 else H
        key, k1, k2, k3, k4 = jax.random.split(key, 5)
        weights["w_ih"].append(jax.random.uniform(k1, (4 * H, d_in_l), jnp.float32, -k, k))
        weights["w_hh"].append(jax.random.uniform(k2, (4 * H, H), jnp.float32, -k, k))
        weights["b_ih"].append(jax.random.uniform(k3, (4 * H,), jnp.float32, -k, k))
        weights["b_hh"].append(jax.random.uniform(k4, (4 * H,), jnp.float32, -k, k))
    key, kf1, kf2, kx = jax.random.split(key, 4)
    weights["w_fc"] = jax.random.uniform(kf1, (O, H), jnp.float32, -k, k)
    weights["b_fc"] = jax.random.uniform(kf2, (O,), jnp.float32, -k, k)

    x = jax.random.normal(kx, (B, T, D_IN), jnp.float32)

    ref = jax.block_until_ready(_ref_forward(x, weights, H))

    # Default f32 MXU operands: tight match against the f32 reference.
    out = jax.block_until_ready(lstmnn_forward(x, weights, H, O))
    assert out.shape == (B, O), out.shape
    max_err = float(jnp.max(jnp.abs(out - ref)))
    assert max_err < 1e-3, f"f32 kernel mismatch vs reference: {max_err}"

    # bf16 MXU operands (v6e/v7x latency optimization from the review):
    # validate accumulation drift against a looser tolerance.
    out_bf16 = jax.block_until_ready(
        lstmnn_forward(x, weights, H, O, mxu_dtype=jnp.bfloat16))
    max_err_bf16 = float(jnp.max(jnp.abs(out_bf16 - ref)))
    assert max_err_bf16 < 5e-2, f"bf16 kernel drift vs reference: {max_err_bf16}"

    print("KERNEL_OK")
</pallas_src>

<mosaic_0001>
module attributes {stable_mosaic.version = 11 : i64} {
  func.func @kernel(%arg0: memref<8x8x128xf32, #tpu.memory_space<vmem>>, %arg1: memref<64x256xf32, #tpu.memory_space<vmem>>, %arg2: memref<1x256xf32, #tpu.memory_space<vmem>>, %arg3: memref<32x4xf32, #tpu.memory_space<vmem>>, %arg4: memref<1x4xf32, #tpu.memory_space<vmem>>, %arg5: memref<8x4xf32, #tpu.memory_space<vmem>>) attributes {dimension_semantics = [], scalar_prefetch = 0 : i64, scratch_operands = 0 : i64, tpu.core_type = #tpu.core_type<tc>} {
    %c0 = arith.constant 0 : index
    %c0_0 = arith.constant 0 : index
    %0 = vector.load %arg1[%c0, %c0_0] : memref<64x256xf32, #tpu.memory_space<vmem>>, vector<64x256xf32>
    %c0_1 = arith.constant 0 : index
    %c0_2 = arith.constant 0 : index
    %1 = vector.load %arg2[%c0_1, %c0_2] : memref<1x256xf32, #tpu.memory_space<vmem>>, vector<1x256xf32>
    %cst = arith.constant 0.000000e+00 : f32
    %2 = vector.broadcast %cst : f32 to vector<8x32xf32>
    %cst_3 = arith.constant 0.000000e+00 : f32
    %3 = vector.broadcast %cst_3 : f32 to vector<8x32xf32>
    %c0_i32 = arith.constant 0 : i32
    %4 = tpu.concatenate %2, %3 in 1 : vector<8x32xf32>, vector<8x32xf32> -> vector<8x64xf32>
    %cst_4 = arith.constant dense<0.000000e+00> : vector<8x256xf32>
    %5 = tpu.matmul %4, %0, %cst_4 {dimension_numbers = #tpu.dot_dimension_numbers<[1], [0], [0], [1], [0, 0, 1, 1], [], []>} : vector<8x64xf32>, vector<64x256xf32>, vector<8x256xf32> -> vector<8x256xf32>
    %6 = vector.broadcast %1 : vector<1x256xf32> to vector<8x256xf32>
    %7 = arith.addf %5, %6 : vector<8x256xf32>
    %c7_i32 = arith.constant 7 : i32
    %8 = arith.minsi %c0_i32, %c7_i32 : i32
    %9 = arith.index_cast %8 : i32 to index
    %c0_5 = arith.constant 0 : index
    %c0_6 = arith.constant 0 : index
    %10 = vector.load %arg0[%9, %c0_5, %c0_6] : memref<8x8x128xf32, #tpu.memory_space<vmem>>, vector<1x8x128xf32>
    %11 = vector.shape_cast %10 : vector<1x8x128xf32> to vector<8x128xf32>
    %12 = vector.extract_strided_slice %7 {offsets = [0, 0], sizes = [8, 128], strides = [1, 1]} : vector<8x256xf32> to vector<8x128xf32>
    %13 = arith.addf %12, %11 : vector<8x128xf32>
    %14 = arith.negf %13 : vector<8x128xf32>
    %15 = math.exp %14 : vector<8x128xf32>
    %cst_7 = arith.constant 1.000000e+00 : f32
    %16 = vector.broadcast %cst_7 : f32 to vector<8x128xf32>
    %17 = arith.addf %16, %15 : vector<8x128xf32>
    %18 = arith.divf %16, %17 : vector<8x128xf32>
    %19 = math.tanh %13 : vector<8x128xf32>
    %20 = vector.extract_strided_slice %18 {offsets = [0, 0], sizes = [8, 32], strides = [1, 1]} : vector<8x128xf32> to vector<8x32xf32>
    %21 = vector.extract_strided_slice %18 {offsets = [0, 32], sizes = [8, 32], strides = [1, 1]} : vector<8x128xf32> to vector<8x32xf32>
    %22 = vector.extract_strided_slice %19 {offsets = [0, 64], sizes = [8, 32], strides = [1, 1]} : vector<8x128xf32> to vector<8x32xf32>
    %23 = vector.extract_strided_slice %18 {offsets = [0, 96], sizes = [8, 32], strides = [1, 1]} : vector<8x128xf32> to vector<8x32xf32>
    %24 = arith.mulf %21, %2 : vector<8x32xf32>
    %25 = arith.mulf %20, %22 : vector<8x32xf32>
    %26 = arith.addf %24, %25 : vector<8x32xf32>
    %27 = math.tanh %26 : vector<8x32xf32>
    %28 = arith.mulf %23, %27 : vector<8x32xf32>
    %c8_i32 = arith.constant 8 : i32
    %29 = arith.cmpi slt, %c0_i32, %c8_i32 : i32
    %30 = arith.select %29, %28, %2 : vector<8x32xf32>
    %31 = arith.select %29, %26, %2 : vector<8x32xf32>
    %32 = vector.extract_strided_slice %7 {offsets = [0, 128], sizes = [8, 128], strides = [1, 1]} : vector<8x256xf32> to vector<8x128xf32>
    %33 = arith.negf %32 : vector<8x128xf32>
    %34 = math.exp %33 : vector<8x128xf32>
    %cst_8 = arith.constant 1.000000e+00 : f32
    %35 = vector.broadcast %cst_8 : f32 to vector<8x128xf32>
    %36 = arith.addf %35, %34 : vector<8x128xf32>
    %37 = arith.divf %35, %36 : vector<8x128xf32>
    %38 = math.tanh %32 : vector<8x128xf32>
    %39 = vector.extract_strided_slice %37 {offsets = [0, 0], sizes = [8, 32], strides = [1, 1]} : vector<8x128xf32> to vector<8x32xf32>
    %40 = vector.extract_strided_slice %37 {offsets = [0, 32], sizes = [8, 32], strides = [1, 1]} : vector<8x128xf32> to vector<8x32xf32>
    %41 = vector.extract_strided_slice %38 {offsets = [0, 64], sizes = [8, 32], strides = [1, 1]} : vector<8x128xf32> to vector<8x32xf32>
    %42 = vector.extract_strided_slice %37 {offsets = [0, 96], sizes = [8, 32], strides = [1, 1]} : vector<8x128xf32> to vector<8x32xf32>
    %43 = arith.mulf %40, %3 : vector<8x32xf32>
    %44 = arith.mulf %39, %41 : vector<8x32xf32>
    %45 = arith.addf %43, %44 : vector<8x32xf32>
    %46 = math.tanh %45 : vector<8x32xf32>
    %47 = arith.mulf %42, %46 : vector<8x32xf32>
    %c1_i32 = arith.constant 1 : i32
    %48 = arith.cmpi sge, %c0_i32, %c1_i32 : i32
    %c9_i32 = arith.constant 9 : i32
    %49 = arith.cmpi slt, %c0_i32, %c9_i32 : i32
    %50 = arith.andi %48, %49 : i1
    %51 = arith.select %50, %47, %3 : vector<8x32xf32>
    %52 = arith.select %50, %45, %3 : vector<8x32xf32>
    %c1_i32_9 = arith.constant 1 : i32
    %53 = tpu.concatenate %30, %51 in 1 : vector<8x32xf32>, vector<8x32xf32> -> vector<8x64xf32>
    %cst_10 = arith.constant dense<0.000000e+00> : vector<8x256xf32>
    %54 = tpu.matmul %53, %0, %cst_10 {dimension_numbers = #tpu.dot_dimension_numbers<[1], [0], [0], [1], [0, 0, 1, 1], [], []>} : vector<8x64xf32>, vector<64x256xf32>, vector<8x256xf32> -> vector<8x256xf32>
    %55 = vector.broadcast %1 : vector<1x256xf32> to vector<8x256xf32>
    %56 = arith.addf %54, %55 : vector<8x256xf32>
    %c7_i32_11 = arith.constant 7 : i32
    %57 = arith.minsi %c1_i32_9, %c7_i32_11 : i32
    %58 = arith.index_cast %57 : i32 to index
    %c0_12 = arith.constant 0 : index
    %c0_13 = arith.constant 0 : index
    %59 = vector.load %arg0[%58, %c0_12, %c0_13] : memref<8x8x128xf32, #tpu.memory_space<vmem>>, vector<1x8x128xf32>
    %60 = vector.shape_cast %59 : vector<1x8x128xf32> to vector<8x128xf32>
    %61 = vector.extract_strided_slice %56 {offsets = [0, 0], sizes = [8, 128], strides = [1, 1]} : vector<8x256xf32> to vector<8x128xf32>
    %62 = arith.addf %61, %60 : vector<8x128xf32>
    %63 = arith.negf %62 : vector<8x128xf32>
    %64 = math.exp %63 : vector<8x128xf32>
    %cst_14 = arith.constant 1.000000e+00 : f32
    %65 = vector.broadcast %cst_14 : f32 to vector<8x128xf32>
    %66 = arith.addf %65, %64 : vector<8x128xf32>
    %67 = arith.divf %65, %66 : vector<8x128xf32>
    %68 = math.tanh %62 : vector<8x128xf32>
    %69 = vector.extract_strided_slice %67 {offsets = [0, 0], sizes = [8, 32], strides = [1, 1]} : vector<8x128xf32> to vector<8x32xf32>
    %70 = vector.extract_strided_slice %67 {offsets = [0, 32], sizes = [8, 32], strides = [1, 1]} : vector<8x128xf32> to vector<8x32xf32>
    %71 = vector.extract_strided_slice %68 {offsets = [0, 64], sizes = [8, 32], strides = [1, 1]} : vector<8x128xf32> to vector<8x32xf32>
    %72 = vector.extract_strided_slice %67 {offsets = [0, 96], sizes = [8, 32], strides = [1, 1]} : vector<8x128xf32> to vector<8x32xf32>
    %73 = arith.mulf %70, %31 : vector<8x32xf32>
    %74 = arith.mulf %69, %71 : vector<8x32xf32>
    %75 = arith.addf %73, %74 : vector<8x32xf32>
    %76 = math.tanh %75 : vector<8x32xf32>
    %77 = arith.mulf %72, %76 : vector<8x32xf32>
    %c8_i32_15 = arith.constant 8 : i32
    %78 = arith.cmpi slt, %c1_i32_9, %c8_i32_15 : i32
    %79 = arith.select %78, %77, %30 : vector<8x32xf32>
    %80 = arith.select %78, %75, %31 : vector<8x32xf32>
    %81 = vector.extract_strided_slice %56 {offsets = [0, 128], sizes = [8, 128], strides = [1, 1]} : vector<8x256xf32> to vector<8x128xf32>
    %82 = arith.negf %81 : vector<8x128xf32>
    %83 = math.exp %82 : vector<8x128xf32>
    %cst_16 = arith.constant 1.000000e+00 : f32
    %84 = vector.broadcast %cst_16 : f32 to vector<8x128xf32>
    %85 = arith.addf %84, %83 : vector<8x128xf32>
    %86 = arith.divf %84, %85 : vector<8x128xf32>
    %87 = math.tanh %81 : vector<8x128xf32>
    %88 = vector.extract_strided_slice %86 {offsets = [0, 0], sizes = [8, 32], strides = [1, 1]} : vector<8x128xf32> to vector<8x32xf32>
    %89 = vector.extract_strided_slice %86 {offsets = [0, 32], sizes = [8, 32], strides = [1, 1]} : vector<8x128xf32> to vector<8x32xf32>
    %90 = vector.extract_strided_slice %87 {offsets = [0, 64], sizes = [8, 32], strides = [1, 1]} : vector<8x128xf32> to vector<8x32xf32>
    %91 = vector.extract_strided_slice %86 {offsets = [0, 96], sizes = [8, 32], strides = [1, 1]} : vector<8x128xf32> to vector<8x32xf32>
    %92 = arith.mulf %89, %52 : vector<8x32xf32>
    %93 = arith.mulf %88, %90 : vector<8x32xf32>
    %94 = arith.addf %92, %93 : vector<8x32xf32>
    %95 = math.tanh %94 : vector<8x32xf32>
    %96 = arith.mulf %91, %95 : vector<8x32xf32>
    %c1_i32_17 = arith.constant 1 : i32
    %97 = arith.cmpi sge, %c1_i32_9, %c1_i32_17 : i32
    %c9_i32_18 = arith.constant 9 : i32
    %98 = arith.cmpi slt, %c1_i32_9, %c9_i32_18 : i32
    %99 = arith.andi %97, %98 : i1
    %100 = arith.select %99, %96, %51 : vector<8x32xf32>
    %101 = arith.select %99, %94, %52 : vector<8x32xf32>
    %c2_i32 = arith.constant 2 : i32
    %102 = tpu.concatenate %79, %100 in 1 : vector<8x32xf32>, vector<8x32xf32> -> vector<8x64xf32>
    %cst_19 = arith.constant dense<0.000000e+00> : vector<8x256xf32>
    %103 = tpu.matmul %102, %0, %cst_19 {dimension_numbers = #tpu.dot_dimension_numbers<[1], [0], [0], [1], [0, 0, 1, 1], [], []>} : vector<8x64xf32>, vector<64x256xf32>, vector<8x256xf32> -> vector<8x256xf32>
    %104 = vector.broadcast %1 : vector<1x256xf32> to vector<8x256xf32>
    %105 = arith.addf %103, %104 : vector<8x256xf32>
    %c7_i32_20 = arith.constant 7 : i32
    %106 = arith.minsi %c2_i32, %c7_i32_20 : i32
    %107 = arith.index_cast %106 : i32 to index
    %c0_21 = arith.constant 0 : index
    %c0_22 = arith.constant 0 : index
    %108 = vector.load %arg0[%107, %c0_21, %c0_22] : memref<8x8x128xf32, #tpu.memory_space<vmem>>, vector<1x8x128xf32>
    %109 = vector.shape_cast %108 : vector<1x8x128xf32> to vector<8x128xf32>
    %110 = vector.extract_strided_slice %105 {offsets = [0, 0], sizes = [8, 128], strides = [1, 1]} : vector<8x256xf32> to vector<8x128xf32>
    %111 = arith.addf %110, %109 : vector<8x128xf32>
    %112 = arith.negf %111 : vector<8x128xf32>
    %113 = math.exp %112 : vector<8x128xf32>
    %cst_23 = arith.constant 1.000000e+00 : f32
    %114 = vector.broadcast %cst_23 : f32 to vector<8x128xf32>
    %115 = arith.addf %114, %113 : vector<8x128xf32>
    %116 = arith.divf %114, %115 : vector<8x128xf32>
    %117 = math.tanh %111 : vector<8x128xf32>
    %118 = vector.extract_strided_slice %116 {offsets = [0, 0], sizes = [8, 32], strides = [1, 1]} : vector<8x128xf32> to vector<8x32xf32>
    %119 = vector.extract_strided_slice %116 {offsets = [0, 32], sizes = [8, 32], strides = [1, 1]} : vector<8x128xf32> to vector<8x32xf32>
    %120 = vector.extract_strided_slice %117 {offsets = [0, 64], sizes = [8, 32], strides = [1, 1]} : vector<8x128xf32> to vector<8x32xf32>
    %121 = vector.extract_strided_slice %116 {offsets = [0, 96], sizes = [8, 32], strides = [1, 1]} : vector<8x128xf32> to vector<8x32xf32>
    %122 = arith.mulf %119, %80 : vector<8x32xf32>
    %123 = arith.mulf %118, %120 : vector<8x32xf32>
    %124 = arith.addf %122, %123 : vector<8x32xf32>
    %125 = math.tanh %124 : vector<8x32xf32>
    %126 = arith.mulf %121, %125 : vector<8x32xf32>
    %c8_i32_24 = arith.constant 8 : i32
    %127 = arith.cmpi slt, %c2_i32, %c8_i32_24 : i32
    %128 = arith.select %127, %126, %79 : vector<8x32xf32>
    %129 = arith.select %127, %124, %80 : vector<8x32xf32>
    %130 = vector.extract_strided_slice %105 {offsets = [0, 128], sizes = [8, 128], strides = [1, 1]} : vector<8x256xf32> to vector<8x128xf32>
    %131 = arith.negf %130 : vector<8x128xf32>
    %132 = math.exp %131 : vector<8x128xf32>
    %cst_25 = arith.constant 1.000000e+00 : f32
    %133 = vector.broadcast %cst_25 : f32 to vector<8x128xf32>
    %134 = arith.addf %133, %132 : vector<8x128xf32>
    %135 = arith.divf %133, %134 : vector<8x128xf32>
    %136 = math.tanh %130 : vector<8x128xf32>
    %137 = vector.extract_strided_slice %135 {offsets = [0, 0], sizes = [8, 32], strides = [1, 1]} : vector<8x128xf32> to vector<8x32xf32>
    %138 = vector.extract_strided_slice %135 {offsets = [0, 32], sizes = [8, 32], strides = [1, 1]} : vector<8x128xf32> to vector<8x32xf32>
    %139 = vector.extract_strided_slice %136 {offsets = [0, 64], sizes = [8, 32], strides = [1, 1]} : vector<8x128xf32> to vector<8x32xf32>
    %140 = vector.extract_strided_slice %135 {offsets = [0, 96], sizes = [8, 32], strides = [1, 1]} : vector<8x128xf32> to vector<8x32xf32>
    %141 = arith.mulf %138, %101 : vector<8x32xf32>
    %142 = arith.mulf %137, %139 : vector<8x32xf32>
    %143 = arith.addf %141, %142 : vector<8x32xf32>
    %144 = math.tanh %143 : vector<8x32xf32>
    %145 = arith.mulf %140, %144 : vector<8x32xf32>
    %c1_i32_26 = arith.constant 1 : i32
    %146 = arith.cmpi sge, %c2_i32, %c1_i32_26 : i32
    %c9_i32_27 = arith.constant 9 : i32
    %147 = arith.cmpi slt, %c2_i32, %c9_i32_27 : i32
    %148 = arith.andi %146, %147 : i1
    %149 = arith.select %148, %145, %100 : vector<8x32xf32>
    %150 = arith.select %148, %143, %101 : vector<8x32xf32>
    %c3_i32 = arith.constant 3 : i32
    %151 = tpu.concatenate %128, %149 in 1 : vector<8x32xf32>, vector<8x32xf32> -> vector<8x64xf32>
    %cst_28 = arith.constant dense<0.000000e+00> : vector<8x256xf32>
    %152 = tpu.matmul %151, %0, %cst_28 {dimension_numbers = #tpu.dot_dimension_numbers<[1], [0], [0], [1], [0, 0, 1, 1], [], []>} : vector<8x64xf32>, vector<64x256xf32>, vector<8x256xf32> -> vector<8x256xf32>
    %153 = vector.broadcast %1 : vector<1x256xf32> to vector<8x256xf32>
    %154 = arith.addf %152, %153 : vector<8x256xf32>
    %c7_i32_29 = arith.constant 7 : i32
    %155 = arith.minsi %c3_i32, %c7_i32_29 : i32
    %156 = arith.index_cast %155 : i32 to index
    %c0_30 = arith.constant 0 : index
    %c0_31 = arith.constant 0 : index
    %157 = vector.load %arg0[%156, %c0_30, %c0_31] : memref<8x8x128xf32, #tpu.memory_space<vmem>>, vector<1x8x128xf32>
    %158 = vector.shape_cast %157 : vector<1x8x128xf32> to vector<8x128xf32>
    %159 = vector.extract_strided_slice %154 {offsets = [0, 0], sizes = [8, 128], strides = [1, 1]} : vector<8x256xf32> to vector<8x128xf32>
    %160 = arith.addf %159, %158 : vector<8x128xf32>
    %161 = arith.negf %160 : vector<8x128xf32>
    %162 = math.exp %161 : vector<8x128xf32>
    %cst_32 = arith.constant 1.000000e+00 : f32
    %163 = vector.broadcast %cst_32 : f32 to vector<8x128xf32>
    %164 = arith.addf %163, %162 : vector<8x128xf32>
    %165 = arith.divf %163, %164 : vector<8x128xf32>
    %166 = math.tanh %160 : vector<8x128xf32>
    %167 = vector.extract_strided_slice %165 {offsets = [0, 0], sizes = [8, 32], strides = [1, 1]} : vector<8x128xf32> to vector<8x32xf32>
    %168 = vector.extract_strided_slice %165 {offsets = [0, 32], sizes = [8, 32], strides = [1, 1]} : vector<8x128xf32> to vector<8x32xf32>
    %169 = vector.extract_strided_slice %166 {offsets = [0, 64], sizes = [8, 32], strides = [1, 1]} : vector<8x128xf32> to vector<8x32xf32>
    %170 = vector.extract_strided_slice %165 {offsets = [0, 96], sizes = [8, 32], strides = [1, 1]} : vector<8x128xf32> to vector<8x32xf32>
    %171 = arith.mulf %168, %129 : vector<8x32xf32>
    %172 = arith.mulf %167, %169 : vector<8x32xf32>
    %173 = arith.addf %171, %172 : vector<8x32xf32>
    %174 = math.tanh %173 : vector<8x32xf32>
    %175 = arith.mulf %170, %174 : vector<8x32xf32>
    %c8_i32_33 = arith.constant 8 : i32
    %176 = arith.cmpi slt, %c3_i32, %c8_i32_33 : i32
    %177 = arith.select %176, %175, %128 : vector<8x32xf32>
    %178 = arith.select %176, %173, %129 : vector<8x32xf32>
    %179 = vector.extract_strided_slice %154 {offsets = [0, 128], sizes = [8, 128], strides = [1, 1]} : vector<8x256xf32> to vector<8x128xf32>
    %180 = arith.negf %179 : vector<8x128xf32>
    %181 = math.exp %180 : vector<8x128xf32>
    %cst_34 = arith.constant 1.000000e+00 : f32
    %182 = vector.broadcast %cst_34 : f32 to vector<8x128xf32>
    %183 = arith.addf %182, %181 : vector<8x128xf32>
    %184 = arith.divf %182, %183 : vector<8x128xf32>
    %185 = math.tanh %179 : vector<8x128xf32>
    %186 = vector.extract_strided_slice %184 {offsets = [0, 0], sizes = [8, 32], strides = [1, 1]} : vector<8x128xf32> to vector<8x32xf32>
    %187 = vector.extract_strided_slice %184 {offsets = [0, 32], sizes = [8, 32], strides = [1, 1]} : vector<8x128xf32> to vector<8x32xf32>
    %188 = vector.extract_strided_slice %185 {offsets = [0, 64], sizes = [8, 32], strides = [1, 1]} : vector<8x128xf32> to vector<8x32xf32>
    %189 = vector.extract_strided_slice %184 {offsets = [0, 96], sizes = [8, 32], strides = [1, 1]} : vector<8x128xf32> to vector<8x32xf32>
    %190 = arith.mulf %187, %150 : vector<8x32xf32>
    %191 = arith.mulf %186, %188 : vector<8x32xf32>
    %192 = arith.addf %190, %191 : vector<8x32xf32>
    %193 = math.tanh %192 : vector<8x32xf32>
    %194 = arith.mulf %189, %193 : vector<8x32xf32>
    %c1_i32_35 = arith.constant 1 : i32
    %195 = arith.cmpi sge, %c3_i32, %c1_i32_35 : i32
    %c9_i32_36 = arith.constant 9 : i32
    %196 = arith.cmpi slt, %c3_i32, %c9_i32_36 : i32
    %197 = arith.andi %195, %196 : i1
    %198 = arith.select %197, %194, %149 : vector<8x32xf32>
    %199 = arith.select %197, %192, %150 : vector<8x32xf32>
    %c4_i32 = arith.constant 4 : i32
    %200 = tpu.concatenate %177, %198 in 1 : vector<8x32xf32>, vector<8x32xf32> -> vector<8x64xf32>
    %cst_37 = arith.constant dense<0.000000e+00> : vector<8x256xf32>
    %201 = tpu.matmul %200, %0, %cst_37 {dimension_numbers = #tpu.dot_dimension_numbers<[1], [0], [0], [1], [0, 0, 1, 1], [], []>} : vector<8x64xf32>, vector<64x256xf32>, vector<8x256xf32> -> vector<8x256xf32>
    %202 = vector.broadcast %1 : vector<1x256xf32> to vector<8x256xf32>
    %203 = arith.addf %201, %202 : vector<8x256xf32>
    %c7_i32_38 = arith.constant 7 : i32
    %204 = arith.minsi %c4_i32, %c7_i32_38 : i32
    %205 = arith.index_cast %204 : i32 to index
    %c0_39 = arith.constant 0 : index
    %c0_40 = arith.constant 0 : index
    %206 = vector.load %arg0[%205, %c0_39, %c0_40] : memref<8x8x128xf32, #tpu.memory_space<vmem>>, vector<1x8x128xf32>
    %207 = vector.shape_cast %206 : vector<1x8x128xf32> to vector<8x128xf32>
    %208 = vector.extract_strided_slice %203 {offsets = [0, 0], sizes = [8, 128], strides = [1, 1]} : vector<8x256xf32> to vector<8x128xf32>
    %209 = arith.addf %208, %207 : vector<8x128xf32>
    %210 = arith.negf %209 : vector<8x128xf32>
    %211 = math.exp %210 : vector<8x128xf32>
    %cst_41 = arith.constant 1.000000e+00 : f32
    %212 = vector.broadcast %cst_41 : f32 to vector<8x128xf32>
    %213 = arith.addf %212, %211 : vector<8x128xf32>
    %214 = arith.divf %212, %213 : vector<8x128xf32>
    %215 = math.tanh %209 : vector<8x128xf32>
    %216 = vector.extract_strided_slice %214 {offsets = [0, 0], sizes = [8, 32], strides = [1, 1]} : vector<8x128xf32> to vector<8x32xf32>
    %217 = vector.extract_strided_slice %214 {offsets = [0, 32], sizes = [8, 32], strides = [1, 1]} : vector<8x128xf32> to vector<8x32xf32>
    %218 = vector.extract_strided_slice %215 {offsets = [0, 64], sizes = [8, 32], strides = [1, 1]} : vector<8x128xf32> to vector<8x32xf32>
    %219 = vector.extract_strided_slice %214 {offsets = [0, 96], sizes = [8, 32], strides = [1, 1]} : vector<8x128xf32> to vector<8x32xf32>
    %220 = arith.mulf %217, %178 : vector<8x32xf32>
    %221 = arith.mulf %216, %218 : vector<8x32xf32>
    %222 = arith.addf %220, %221 : vector<8x32xf32>
    %223 = math.tanh %222 : vector<8x32xf32>
    %224 = arith.mulf %219, %223 : vector<8x32xf32>
    %c8_i32_42 = arith.constant 8 : i32
    %225 = arith.cmpi slt, %c4_i32, %c8_i32_42 : i32
    %226 = arith.select %225, %224, %177 : vector<8x32xf32>
    %227 = arith.select %225, %222, %178 : vector<8x32xf32>
    %228 = vector.extract_strided_slice %203 {offsets = [0, 128], sizes = [8, 128], strides = [1, 1]} : vector<8x256xf32> to vector<8x128xf32>
    %229 = arith.negf %228 : vector<8x128xf32>
    %230 = math.exp %229 : vector<8x128xf32>
    %cst_43 = arith.constant 1.000000e+00 : f32
    %231 = vector.broadcast %cst_43 : f32 to vector<8x128xf32>
    %232 = arith.addf %231, %230 : vector<8x128xf32>
    %233 = arith.divf %231, %232 : vector<8x128xf32>
    %234 = math.tanh %228 : vector<8x128xf32>
    %235 = vector.extract_strided_slice %233 {offsets = [0, 0], sizes = [8, 32], strides = [1, 1]} : vector<8x128xf32> to vector<8x32xf32>
    %236 = vector.extract_strided_slice %233 {offsets = [0, 32], sizes = [8, 32], strides = [1, 1]} : vector<8x128xf32> to vector<8x32xf32>
    %237 = vector.extract_strided_slice %234 {offsets = [0, 64], sizes = [8, 32], strides = [1, 1]} : vector<8x128xf32> to vector<8x32xf32>
    %238 = vector.extract_strided_slice %233 {offsets = [0, 96], sizes = [8, 32], strides = [1, 1]} : vector<8x128xf32> to vector<8x32xf32>
    %239 = arith.mulf %236, %199 : vector<8x32xf32>
    %240 = arith.mulf %235, %237 : vector<8x32xf32>
    %241 = arith.addf %239, %240 : vector<8x32xf32>
    %242 = math.tanh %241 : vector<8x32xf32>
    %243 = arith.mulf %238, %242 : vector<8x32xf32>
    %c1_i32_44 = arith.constant 1 : i32
    %244 = arith.cmpi sge, %c4_i32, %c1_i32_44 : i32
    %c9_i32_45 = arith.constant 9 : i32
    %245 = arith.cmpi slt, %c4_i32, %c9_i32_45 : i32
    %246 = arith.andi %244, %245 : i1
    %247 = arith.select %246, %243, %198 : vector<8x32xf32>
    %248 = arith.select %246, %241, %199 : vector<8x32xf32>
    %c5_i32 = arith.constant 5 : i32
    %249 = tpu.concatenate %226, %247 in 1 : vector<8x32xf32>, vector<8x32xf32> -> vector<8x64xf32>
    %cst_46 = arith.constant dense<0.000000e+00> : vector<8x256xf32>
    %250 = tpu.matmul %249, %0, %cst_46 {dimension_numbers = #tpu.dot_dimension_numbers<[1], [0], [0], [1], [0, 0, 1, 1], [], []>} : vector<8x64xf32>, vector<64x256xf32>, vector<8x256xf32> -> vector<8x256xf32>
    %251 = vector.broadcast %1 : vector<1x256xf32> to vector<8x256xf32>
    %252 = arith.addf %250, %251 : vector<8x256xf32>
    %c7_i32_47 = arith.constant 7 : i32
    %253 = arith.minsi %c5_i32, %c7_i32_47 : i32
    %254 = arith.index_cast %253 : i32 to index
    %c0_48 = arith.constant 0 : index
    %c0_49 = arith.constant 0 : index
    %255 = vector.load %arg0[%254, %c0_48, %c0_49] : memref<8x8x128xf32, #tpu.memory_space<vmem>>, vector<1x8x128xf32>
    %256 = vector.shape_cast %255 : vector<1x8x128xf32> to vector<8x128xf32>
    %257 = vector.extract_strided_slice %252 {offsets = [0, 0], sizes = [8, 128], strides = [1, 1]} : vector<8x256xf32> to vector<8x128xf32>
    %258 = arith.addf %257, %256 : vector<8x128xf32>
    %259 = arith.negf %258 : vector<8x128xf32>
    %260 = math.exp %259 : vector<8x128xf32>
    %cst_50 = arith.constant 1.000000e+00 : f32
    %261 = vector.broadcast %cst_50 : f32 to vector<8x128xf32>
    %262 = arith.addf %261, %260 : vector<8x128xf32>
    %263 = arith.divf %261, %262 : vector<8x128xf32>
    %264 = math.tanh %258 : vector<8x128xf32>
    %265 = vector.extract_strided_slice %263 {offsets = [0, 0], sizes = [8, 32], strides = [1, 1]} : vector<8x128xf32> to vector<8x32xf32>
    %266 = vector.extract_strided_slice %263 {offsets = [0, 32], sizes = [8, 32], strides = [1, 1]} : vector<8x128xf32> to vector<8x32xf32>
    %267 = vector.extract_strided_slice %264 {offsets = [0, 64], sizes = [8, 32], strides = [1, 1]} : vector<8x128xf32> to vector<8x32xf32>
    %268 = vector.extract_strided_slice %263 {offsets = [0, 96], sizes = [8, 32], strides = [1, 1]} : vector<8x128xf32> to vector<8x32xf32>
    %269 = arith.mulf %266, %227 : vector<8x32xf32>
    %270 = arith.mulf %265, %267 : vector<8x32xf32>
    %271 = arith.addf %269, %270 : vector<8x32xf32>
    %272 = math.tanh %271 : vector<8x32xf32>
    %273 = arith.mulf %268, %272 : vector<8x32xf32>
    %c8_i32_51 = arith.constant 8 : i32
    %274 = arith.cmpi slt, %c5_i32, %c8_i32_51 : i32
    %275 = arith.select %274, %273, %226 : vector<8x32xf32>
    %276 = arith.select %274, %271, %227 : vector<8x32xf32>
    %277 = vector.extract_strided_slice %252 {offsets = [0, 128], sizes = [8, 128], strides = [1, 1]} : vector<8x256xf32> to vector<8x128xf32>
    %278 = arith.negf %277 : vector<8x128xf32>
    %279 = math.exp %278 : vector<8x128xf32>
    %cst_52 = arith.constant 1.000000e+00 : f32
    %280 = vector.broadcast %cst_52 : f32 to vector<8x128xf32>
    %281 = arith.addf %280, %279 : vector<8x128xf32>
    %282 = arith.divf %280, %281 : vector<8x128xf32>
    %283 = math.tanh %277 : vector<8x128xf32>
    %284 = vector.extract_strided_slice %282 {offsets = [0, 0], sizes = [8, 32], strides = [1, 1]} : vector<8x128xf32> to vector<8x32xf32>
    %285 = vector.extract_strided_slice %282 {offsets = [0, 32], sizes = [8, 32], strides = [1, 1]} : vector<8x128xf32> to vector<8x32xf32>
    %286 = vector.extract_strided_slice %283 {offsets = [0, 64], sizes = [8, 32], strides = [1, 1]} : vector<8x128xf32> to vector<8x32xf32>
    %287 = vector.extract_strided_slice %282 {offsets = [0, 96], sizes = [8, 32], strides = [1, 1]} : vector<8x128xf32> to vector<8x32xf32>
    %288 = arith.mulf %285, %248 : vector<8x32xf32>
    %289 = arith.mulf %284, %286 : vector<8x32xf32>
    %290 = arith.addf %288, %289 : vector<8x32xf32>
    %291 = math.tanh %290 : vector<8x32xf32>
    %292 = arith.mulf %287, %291 : vector<8x32xf32>
    %c1_i32_53 = arith.constant 1 : i32
    %293 = arith.cmpi sge, %c5_i32, %c1_i32_53 : i32
    %c9_i32_54 = arith.constant 9 : i32
    %294 = arith.cmpi slt, %c5_i32, %c9_i32_54 : i32
    %295 = arith.andi %293, %294 : i1
    %296 = arith.select %295, %292, %247 : vector<8x32xf32>
    %297 = arith.select %295, %290, %248 : vector<8x32xf32>
    %c6_i32 = arith.constant 6 : i32
    %298 = tpu.concatenate %275, %296 in 1 : vector<8x32xf32>, vector<8x32xf32> -> vector<8x64xf32>
    %cst_55 = arith.constant dense<0.000000e+00> : vector<8x256xf32>
    %299 = tpu.matmul %298, %0, %cst_55 {dimension_numbers = #tpu.dot_dimension_numbers<[1], [0], [0], [1], [0, 0, 1, 1], [], []>} : vector<8x64xf32>, vector<64x256xf32>, vector<8x256xf32> -> vector<8x256xf32>
    %300 = vector.broadcast %1 : vector<1x256xf32> to vector<8x256xf32>
    %301 = arith.addf %299, %300 : vector<8x256xf32>
    %c7_i32_56 = arith.constant 7 : i32
    %302 = arith.minsi %c6_i32, %c7_i32_56 : i32
    %303 = arith.index_cast %302 : i32 to index
    %c0_57 = arith.constant 0 : index
    %c0_58 = arith.constant 0 : index
    %304 = vector.load %arg0[%303, %c0_57, %c0_58] : memref<8x8x128xf32, #tpu.memory_space<vmem>>, vector<1x8x128xf32>
    %305 = vector.shape_cast %304 : vector<1x8x128xf32> to vector<8x128xf32>
    %306 = vector.extract_strided_slice %301 {offsets = [0, 0], sizes = [8, 128], strides = [1, 1]} : vector<8x256xf32> to vector<8x128xf32>
    %307 = arith.addf %306, %305 : vector<8x128xf32>
    %308 = arith.negf %307 : vector<8x128xf32>
    %309 = math.exp %308 : vector<8x128xf32>
    %cst_59 = arith.constant 1.000000e+00 : f32
    %310 = vector.broadcast %cst_59 : f32 to vector<8x128xf32>
    %311 = arith.addf %310, %309 : vector<8x128xf32>
    %312 = arith.divf %310, %311 : vector<8x128xf32>
    %313 = math.tanh %307 : vector<8x128xf32>
    %314 = vector.extract_strided_slice %312 {offsets = [0, 0], sizes = [8, 32], strides = [1, 1]} : vector<8x128xf32> to vector<8x32xf32>
    %315 = vector.extract_strided_slice %312 {offsets = [0, 32], sizes = [8, 32], strides = [1, 1]} : vector<8x128xf32> to vector<8x32xf32>
    %316 = vector.extract_strided_slice %313 {offsets = [0, 64], sizes = [8, 32], strides = [1, 1]} : vector<8x128xf32> to vector<8x32xf32>
    %317 = vector.extract_strided_slice %312 {offsets = [0, 96], sizes = [8, 32], strides = [1, 1]} : vector<8x128xf32> to vector<8x32xf32>
    %318 = arith.mulf %315, %276 : vector<8x32xf32>
    %319 = arith.mulf %314, %316 : vector<8x32xf32>
    %320 = arith.addf %318, %319 : vector<8x32xf32>
    %321 = math.tanh %320 : vector<8x32xf32>
    %322 = arith.mulf %317, %321 : vector<8x32xf32>
    %c8_i32_60 = arith.constant 8 : i32
    %323 = arith.cmpi slt, %c6_i32, %c8_i32_60 : i32
    %324 = arith.select %323, %322, %275 : vector<8x32xf32>
    %325 = arith.select %323, %320, %276 : vector<8x32xf32>
    %326 = vector.extract_strided_slice %301 {offsets = [0, 128], sizes = [8, 128], strides = [1, 1]} : vector<8x256xf32> to vector<8x128xf32>
    %327 = arith.negf %326 : vector<8x128xf32>
    %328 = math.exp %327 : vector<8x128xf32>
    %cst_61 = arith.constant 1.000000e+00 : f32
    %329 = vector.broadcast %cst_61 : f32 to vector<8x128xf32>
    %330 = arith.addf %329, %328 : vector<8x128xf32>
    %331 = arith.divf %329, %330 : vector<8x128xf32>
    %332 = math.tanh %326 : vector<8x128xf32>
    %333 = vector.extract_strided_slice %331 {offsets = [0, 0], sizes = [8, 32], strides = [1, 1]} : vector<8x128xf32> to vector<8x32xf32>
    %334 = vector.extract_strided_slice %331 {offsets = [0, 32], sizes = [8, 32], strides = [1, 1]} : vector<8x128xf32> to vector<8x32xf32>
    %335 = vector.extract_strided_slice %332 {offsets = [0, 64], sizes = [8, 32], strides = [1, 1]} : vector<8x128xf32> to vector<8x32xf32>
    %336 = vector.extract_strided_slice %331 {offsets = [0, 96], sizes = [8, 32], strides = [1, 1]} : vector<8x128xf32> to vector<8x32xf32>
    %337 = arith.mulf %334, %297 : vector<8x32xf32>
    %338 = arith.mulf %333, %335 : vector<8x32xf32>
    %339 = arith.addf %337, %338 : vector<8x32xf32>
    %340 = math.tanh %339 : vector<8x32xf32>
    %341 = arith.mulf %336, %340 : vector<8x32xf32>
    %c1_i32_62 = arith.constant 1 : i32
    %342 = arith.cmpi sge, %c6_i32, %c1_i32_62 : i32
    %c9_i32_63 = arith.constant 9 : i32
    %343 = arith.cmpi slt, %c6_i32, %c9_i32_63 : i32
    %344 = arith.andi %342, %343 : i1
    %345 = arith.select %344, %341, %296 : vector<8x32xf32>
    %346 = arith.select %344, %339, %297 : vector<8x32xf32>
    %c7_i32_64 = arith.constant 7 : i32
    %347 = tpu.concatenate %324, %345 in 1 : vector<8x32xf32>, vector<8x32xf32> -> vector<8x64xf32>
    %cst_65 = arith.constant dense<0.000000e+00> : vector<8x256xf32>
    %348 = tpu.matmul %347, %0, %cst_65 {dimension_numbers = #tpu.dot_dimension_numbers<[1], [0], [0], [1], [0, 0, 1, 1], [], []>} : vector<8x64xf32>, vector<64x256xf32>, vector<8x256xf32> -> vector<8x256xf32>
    %349 = vector.broadcast %1 : vector<1x256xf32> to vector<8x256xf32>
    %350 = arith.addf %348, %349 : vector<8x256xf32>
    %c7_i32_66 = arith.constant 7 : i32
    %351 = arith.minsi %c7_i32_64, %c7_i32_66 : i32
    %352 = arith.index_cast %351 : i32 to index
    %c0_67 = arith.constant 0 : index
    %c0_68 = arith.constant 0 : index
    %353 = vector.load %arg0[%352, %c0_67, %c0_68] : memref<8x8x128xf32, #tpu.memory_space<vmem>>, vector<1x8x128xf32>
    %354 = vector.shape_cast %353 : vector<1x8x128xf32> to vector<8x128xf32>
    %355 = vector.extract_strided_slice %350 {offsets = [0, 0], sizes = [8, 128], strides = [1, 1]} : vector<8x256xf32> to vector<8x128xf32>
    %356 = arith.addf %355, %354 : vector<8x128xf32>
    %357 = arith.negf %356 : vector<8x128xf32>
    %358 = math.exp %357 : vector<8x128xf32>
    %cst_69 = arith.constant 1.000000e+00 : f32
    %359 = vector.broadcast %cst_69 : f32 to vector<8x128xf32>
    %360 = arith.addf %359, %358 : vector<8x128xf32>
    %361 = arith.divf %359, %360 : vector<8x128xf32>
    %362 = math.tanh %356 : vector<8x128xf32>
    %363 = vector.extract_strided_slice %361 {offsets = [0, 0], sizes = [8, 32], strides = [1, 1]} : vector<8x128xf32> to vector<8x32xf32>
    %364 = vector.extract_strided_slice %361 {offsets = [0, 32], sizes = [8, 32], strides = [1, 1]} : vector<8x128xf32> to vector<8x32xf32>
    %365 = vector.extract_strided_slice %362 {offsets = [0, 64], sizes = [8, 32], strides = [1, 1]} : vector<8x128xf32> to vector<8x32xf32>
    %366 = vector.extract_strided_slice %361 {offsets = [0, 96], sizes = [8, 32], strides = [1, 1]} : vector<8x128xf32> to vector<8x32xf32>
    %367 = arith.mulf %364, %325 : vector<8x32xf32>
    %368 = arith.mulf %363, %365 : vector<8x32xf32>
    %369 = arith.addf %367, %368 : vector<8x32xf32>
    %370 = math.tanh %369 : vector<8x32xf32>
    %371 = arith.mulf %366, %370 : vector<8x32xf32>
    %c8_i32_70 = arith.constant 8 : i32
    %372 = arith.cmpi slt, %c7_i32_64, %c8_i32_70 : i32
    %373 = arith.select %372, %371, %324 : vector<8x32xf32>
    %374 = arith.select %372, %369, %325 : vector<8x32xf32>
    %375 = vector.extract_strided_slice %350 {offsets = [0, 128], sizes = [8, 128], strides = [1, 1]} : vector<8x256xf32> to vector<8x128xf32>
    %376 = arith.negf %375 : vector<8x128xf32>
    %377 = math.exp %376 : vector<8x128xf32>
    %cst_71 = arith.constant 1.000000e+00 : f32
    %378 = vector.broadcast %cst_71 : f32 to vector<8x128xf32>
    %379 = arith.addf %378, %377 : vector<8x128xf32>
    %380 = arith.divf %378, %379 : vector<8x128xf32>
    %381 = math.tanh %375 : vector<8x128xf32>
    %382 = vector.extract_strided_slice %380 {offsets = [0, 0], sizes = [8, 32], strides = [1, 1]} : vector<8x128xf32> to vector<8x32xf32>
    %383 = vector.extract_strided_slice %380 {offsets = [0, 32], sizes = [8, 32], strides = [1, 1]} : vector<8x128xf32> to vector<8x32xf32>
    %384 = vector.extract_strided_slice %381 {offsets = [0, 64], sizes = [8, 32], strides = [1, 1]} : vector<8x128xf32> to vector<8x32xf32>
    %385 = vector.extract_strided_slice %380 {offsets = [0, 96], sizes = [8, 32], strides = [1, 1]} : vector<8x128xf32> to vector<8x32xf32>
    %386 = arith.mulf %383, %346 : vector<8x32xf32>
    %387 = arith.mulf %382, %384 : vector<8x32xf32>
    %388 = arith.addf %386, %387 : vector<8x32xf32>
    %389 = math.tanh %388 : vector<8x32xf32>
    %390 = arith.mulf %385, %389 : vector<8x32xf32>
    %c1_i32_72 = arith.constant 1 : i32
    %391 = arith.cmpi sge, %c7_i32_64, %c1_i32_72 : i32
    %c9_i32_73 = arith.constant 9 : i32
    %392 = arith.cmpi slt, %c7_i32_64, %c9_i32_73 : i32
    %393 = arith.andi %391, %392 : i1
    %394 = arith.select %393, %390, %345 : vector<8x32xf32>
    %395 = arith.select %393, %388, %346 : vector<8x32xf32>
    %c8_i32_74 = arith.constant 8 : i32
    %396 = tpu.concatenate %373, %394 in 1 : vector<8x32xf32>, vector<8x32xf32> -> vector<8x64xf32>
    %cst_75 = arith.constant dense<0.000000e+00> : vector<8x256xf32>
    %397 = tpu.matmul %396, %0, %cst_75 {dimension_numbers = #tpu.dot_dimension_numbers<[1], [0], [0], [1], [0, 0, 1, 1], [], []>} : vector<8x64xf32>, vector<64x256xf32>, vector<8x256xf32> -> vector<8x256xf32>
    %398 = vector.broadcast %1 : vector<1x256xf32> to vector<8x256xf32>
    %399 = arith.addf %397, %398 : vector<8x256xf32>
    %c7_i32_76 = arith.constant 7 : i32
    %400 = arith.minsi %c8_i32_74, %c7_i32_76 : i32
    %401 = arith.index_cast %400 : i32 to index
    %c0_77 = arith.constant 0 : index
    %c0_78 = arith.constant 0 : index
    %402 = vector.load %arg0[%401, %c0_77, %c0_78] : memref<8x8x128xf32, #tpu.memory_space<vmem>>, vector<1x8x128xf32>
    %403 = vector.shape_cast %402 : vector<1x8x128xf32> to vector<8x128xf32>
    %404 = vector.extract_strided_slice %399 {offsets = [0, 0], sizes = [8, 128], strides = [1, 1]} : vector<8x256xf32> to vector<8x128xf32>
    %405 = arith.addf %404, %403 : vector<8x128xf32>
    %406 = arith.negf %405 : vector<8x128xf32>
    %407 = math.exp %406 : vector<8x128xf32>
    %cst_79 = arith.constant 1.000000e+00 : f32
    %408 = vector.broadcast %cst_79 : f32 to vector<8x128xf32>
    %409 = arith.addf %408, %407 : vector<8x128xf32>
    %410 = arith.divf %408, %409 : vector<8x128xf32>
    %411 = math.tanh %405 : vector<8x128xf32>
    %412 = vector.extract_strided_slice %410 {offsets = [0, 0], sizes = [8, 32], strides = [1, 1]} : vector<8x128xf32> to vector<8x32xf32>
    %413 = vector.extract_strided_slice %410 {offsets = [0, 32], sizes = [8, 32], strides = [1, 1]} : vector<8x128xf32> to vector<8x32xf32>
    %414 = vector.extract_strided_slice %411 {offsets = [0, 64], sizes = [8, 32], strides = [1, 1]} : vector<8x128xf32> to vector<8x32xf32>
    %415 = vector.extract_strided_slice %410 {offsets = [0, 96], sizes = [8, 32], strides = [1, 1]} : vector<8x128xf32> to vector<8x32xf32>
    %416 = arith.mulf %413, %374 : vector<8x32xf32>
    %417 = arith.mulf %412, %414 : vector<8x32xf32>
    %418 = arith.addf %416, %417 : vector<8x32xf32>
    %419 = math.tanh %418 : vector<8x32xf32>
    %420 = arith.mulf %415, %419 : vector<8x32xf32>
    %c8_i32_80 = arith.constant 8 : i32
    %421 = arith.cmpi slt, %c8_i32_74, %c8_i32_80 : i32
    %422 = arith.select %421, %420, %373 : vector<8x32xf32>
    %423 = arith.select %421, %418, %374 : vector<8x32xf32>
    %424 = vector.extract_strided_slice %399 {offsets = [0, 128], sizes = [8, 128], strides = [1, 1]} : vector<8x256xf32> to vector<8x128xf32>
    %425 = arith.negf %424 : vector<8x128xf32>
    %426 = math.exp %425 : vector<8x128xf32>
    %cst_81 = arith.constant 1.000000e+00 : f32
    %427 = vector.broadcast %cst_81 : f32 to vector<8x128xf32>
    %428 = arith.addf %427, %426 : vector<8x128xf32>
    %429 = arith.divf %427, %428 : vector<8x128xf32>
    %430 = math.tanh %424 : vector<8x128xf32>
    %431 = vector.extract_strided_slice %429 {offsets = [0, 0], sizes = [8, 32], strides = [1, 1]} : vector<8x128xf32> to vector<8x32xf32>
    %432 = vector.extract_strided_slice %429 {offsets = [0, 32], sizes = [8, 32], strides = [1, 1]} : vector<8x128xf32> to vector<8x32xf32>
    %433 = vector.extract_strided_slice %430 {offsets = [0, 64], sizes = [8, 32], strides = [1, 1]} : vector<8x128xf32> to vector<8x32xf32>
    %434 = vector.extract_strided_slice %429 {offsets = [0, 96], sizes = [8, 32], strides = [1, 1]} : vector<8x128xf32> to vector<8x32xf32>
    %435 = arith.mulf %432, %395 : vector<8x32xf32>
    %436 = arith.mulf %431, %433 : vector<8x32xf32>
    %437 = arith.addf %435, %436 : vector<8x32xf32>
    %438 = math.tanh %437 : vector<8x32xf32>
    %439 = arith.mulf %434, %438 : vector<8x32xf32>
    %c1_i32_82 = arith.constant 1 : i32
    %440 = arith.cmpi sge, %c8_i32_74, %c1_i32_82 : i32
    %c9_i32_83 = arith.constant 9 : i32
    %441 = arith.cmpi slt, %c8_i32_74, %c9_i32_83 : i32
    %442 = arith.andi %440, %441 : i1
    %443 = arith.select %442, %439, %394 : vector<8x32xf32>
    %444 = arith.select %442, %437, %395 : vector<8x32xf32>
    %c9_i32_84 = arith.constant 9 : i32
    %c0_85 = arith.constant 0 : index
    %c0_86 = arith.constant 0 : index
    %445 = vector.load %arg3[%c0_85, %c0_86] : memref<32x4xf32, #tpu.memory_space<vmem>>, vector<32x4xf32>
    %cst_87 = arith.constant dense<0.000000e+00> : vector<8x4xf32>
    %446 = tpu.matmul %443, %445, %cst_87 {dimension_numbers = #tpu.dot_dimension_numbers<[1], [0], [0], [1], [0, 0, 1, 1], [], []>} : vector<8x32xf32>, vector<32x4xf32>, vector<8x4xf32> -> vector<8x4xf32>
    %c0_88 = arith.constant 0 : index
    %c0_89 = arith.constant 0 : index
    %447 = vector.load %arg4[%c0_88, %c0_89] : memref<1x4xf32, #tpu.memory_space<vmem>>, vector<1x4xf32>
    %448 = vector.broadcast %447 : vector<1x4xf32> to vector<8x4xf32>
    %449 = arith.addf %446, %448 : vector<8x4xf32>
    %c0_90 = arith.constant 0 : index
    %c0_91 = arith.constant 0 : index
    %450 = vector.load %arg5[%c0_90, %c0_91] : memref<8x4xf32, #tpu.memory_space<vmem>>, vector<8x4xf32>
    tpu.vector_store %arg5[%c0_90, %c0_91], %449 {strides = array<i32>} : memref<8x4xf32, #tpu.memory_space<vmem>>, vector<8x4xf32>,
    return
  }
}

</mosaic_0001>

<bundles_post_ra>
// kernel: tpu_custom_call.1
= control target key start
LH: loop header
LB: loop body
LE: loop exit
PB: predicated region body
PF: predicated region fallthrough
CT: control target
= control target key end

     0   :  { %10 = vsyncpa [#allocation3], 0  ;;  %s1759_s0 = inlined_call_operand.hbm [shape: f32[8,8,128], index: 0, kind: input, shape index: {}]   ;;  %s1760_s1 = inlined_call_operand.hbm [shape: f32[64,256], index: 1, kind: input, shape index: {}]   ;;  %s1761_s2 = inlined_call_operand.vmem [shape: f32[1,256], index: 2, kind: input, shape index: {}]   ;;  %s1762_s3 = inlined_call_operand.vmem [shape: f32[32,4], index: 3, kind: input, shape index: {}]   ;;  %s1763_s4 = inlined_call_operand.vmem [shape: f32[1,4], index: 4, kind: input, shape index: {}]   ;;  %s1764_s5 = inlined_call_operand.vmem [shape: f32[8,4], index: 5, kind: output, shape index: {}]  }
   0x1   :  { %s16_s20 = sshll.u32 %s1759_s0, 4  ;;  %s17_s20 = int_to_ptr.hbm [resolvable:$true] %s16_s20 }
   0x2   :  { %11 = vsyncpa [#allocation5], 0  ;;  %s1369_s21 = smov [#allocation2]   ;;  %s29_s25 = sshll.u32 %s1760_s1, 4  ;;  %s30_s25 = int_to_ptr.hbm [resolvable:$true] %s29_s25 }
   0x3   :  { %s18_s22 = sshll.u32 %s1369_s21, 4  ;;  %s1370_s26 = smov 128   ;;  %s19_s22 = int_to_ptr.vmem [resolvable:$true] %s18_s22 }
   0x4   :  { %s1371_s27 = smov 8   ;;  %s1372_s28 = smov [#allocation4]  }
   0x5   :  { %24 = dma.hbm_to_vmem [thread:$0]  %s17_s20, 1024, %s19_s22, [#allocation3], %s1370_s26, %s1370_s26, %s1371_s27  }
   0x6   :  { %s31_s29 = sshll.u32 %s1372_s28, 4  ;;  %s1373_s30 = smov 256   ;;  %s32_s29 = int_to_ptr.vmem [resolvable:$true] %s31_s29 }
   0x7   :  { %s1374_s6 = smov 16  }
   0x8   :  { %37 = dma.hbm_to_vmem [thread:$0]  %s30_s25, 2048, %s32_s29, [#allocation5], %s1373_s30, %s1373_s30, %s1374_s6  }
   0x9   :  { %1365 = dma.done.wait [#allocation3], 1024  }
   0xa   :  { %1366 = vsyncadd [#allocation3], 4294966272 }
   0xb   :  { %1367 = dma.done.wait [#allocation5], 2048  }
   0xc   :  { %1368 = vsyncadd [#allocation5], 4294965248  ;;  %v1414_v0 = vld [vmem:[#allocation4 + $0x70] sm:$0xff]  ;;  %v1416_v1 = vld [vmem:[#allocation4 + $0x60] sm:$0xff]  ;;  %v1375_v8 = vmov 0.0   ;;  %s1376_s7 = smov 64  }
   0xd   :  { %86 = vmatpush.msra.mxu0 %v1414_v0  ;;  %154 = vmatpush.msra.mxu1 %v1414_v0  ;;  %v1420_v2 = vld [vmem:[#allocation4 + $0x50] sm:$0xff]  ;;  %v1425_v3 = vld [vmem:[#allocation4 + $0x40] sm:$0xff]  ;;  %v1485_v35 = vld [vmem:[#allocation4 + $0x78] sm:$0xff]  ;;  %vm141_vm4 = vcmask 261120   ;;  %vm74_vm5 = vcmask 523264  }
   0xe   :  { %283 = vmatpush.msra.mxu3 %v1414_v0  ;;  %v1430_v4 = vld [vmem:[#allocation4 + $0x30] sm:$0xff]  ;;  %v1435_v5 = vld [vmem:[#allocation4 + $0x20] sm:$0xff]  ;;  %v1487_v36 = vld [vmem:[#allocation4 + $0x68] sm:$0xff]  ;;  %174 = vmatpush.msra.mxu2 %v1485_v35 }
   0xf   :  { %87 = vmatpush.msra.mxu0 %v1416_v1  ;;  %155 = vmatpush.msra.mxu1 %v1416_v1  ;;  %v1440_v6 = vld [vmem:[#allocation4 + $0x10] sm:$0xff]  ;;  %v1445_v7 = vld [vmem:[#allocation4] sm:$0xff]  ;;  %v1491_v37 = vld [vmem:[#allocation4 + $0x58] sm:$0xff] }
  0x10   :  { %284 = vmatpush.msra.mxu3 %v1416_v1  ;;  %v1473_v9 = vld [vmem:[%s1761_s2] sm:$0x3]  ;;  %s1377_s2 = smov 32   ;;  %175 = vmatpush.msra.mxu2 %v1487_v36  ;;  %v1495_v38 = vld [vmem:[#allocation4 + $0x48] sm:$0xff]  ;;  %v1499_v39 = vld [vmem:[#allocation4 + $0x38] sm:$0xff] }
  0x11   :  { %88 = vmatpush.msra.mxu0 %v1420_v2  ;;  %156 = vmatpush.msra.mxu1 %v1420_v2  ;;  %v1476_v10 = vperm.slane %v1473_v9, 0  ;;  %v98_v12 = vld [vmem:[#allocation2] sm:$0xff]  ;;  %v1503_v40 = vld [vmem:[#allocation4 + $0x28] sm:$0xff]  ;;  %v1507_v41 = vld [vmem:[#allocation4 + $0x18] sm:$0xff]  ;;  %v1555_v51 = vperm.slane %v1473_v9, 1 }
  0x12   :  { %285 = vmatpush.msra.mxu3 %v1420_v2  ;;  %176 = vmatpush.msra.mxu2 %v1491_v37  ;;  %v1514_v44 = vld [vmem:[#allocation4 + $0x8] sm:$0xff] }
  0x13   :  { %89 = vmatpush.msra.mxu0 %v1425_v3  ;;  %157 = vmatpush.msra.mxu1 %v1425_v3  ;;  %v187_v48 = vld [vmem:[#allocation2 + $0x8] sm:$0xff] }
  0x14   :  { %286 = vmatpush.msra.mxu3 %v1425_v3  ;;  %177 = vmatpush.msra.mxu2 %v1495_v38 }
  0x15   :  { %90 = vmatpush.msra.mxu0 %v1430_v4  ;;  %158 = vmatpush.msra.mxu1 %v1430_v4 }
  0x16   :  { %287 = vmatpush.msra.mxu3 %v1430_v4  ;;  %178 = vmatpush.msra.mxu2 %v1499_v39 }
  0x17   :  { %91 = vmatpush.msra.mxu0 %v1435_v5  ;;  %159 = vmatpush.msra.mxu1 %v1435_v5 }
  0x18   :  { %288 = vmatpush.msra.mxu3 %v1435_v5  ;;  %179 = vmatpush.msra.mxu2 %v1503_v40 }
  0x19   :  { %92 = vmatpush.msra.mxu0 %v1440_v6  ;;  %160 = vmatpush.msra.mxu1 %v1440_v6 }
  0x1a   :  { %289 = vmatpush.msra.mxu3 %v1440_v6  ;;  %180 = vmatpush.msra.mxu2 %v1507_v41 }
  0x1b   :  { %93 = vmatpush.msra.mxu0 %v1445_v7  ;;  %161 = vmatpush.msra.mxu1 %v1445_v7 }
  0x1c   :  { %94 = vmatmul.f32.vlgmr.msra.gmra.mxu0 %v1375_v8  ;;  %290 = vmatpush.msra.mxu3 %v1445_v7 }
  0x1d   :  { %412 = vmatpush.msrb.mxu1 %v1414_v0  ;;  %303 = vmatpush.msrb.mxu0 %v1485_v35 }
  0x1e   :  { %541 = vmatpush.msrb.mxu3 %v1414_v0  ;;  %181 = vmatpush.msra.mxu2 %v1514_v44 }
  0x1f   :  { %413 = vmatpush.msrb.mxu1 %v1416_v1  ;;  %304 = vmatpush.msrb.mxu0 %v1487_v36 }
  0x20   :  { %542 = vmatpush.msrb.mxu3 %v1416_v1  ;;  %432 = vmatpush.msrb.mxu2 %v1485_v35 }
  0x21   :  { %414 = vmatpush.msrb.mxu1 %v1420_v2  ;;  %305 = vmatpush.msrb.mxu0 %v1491_v37 }
  0x22   :  { %543 = vmatpush.msrb.mxu3 %v1420_v2  ;;  %433 = vmatpush.msrb.mxu2 %v1487_v36 }
  0x23   :  { %415 = vmatpush.msrb.mxu1 %v1425_v3  ;;  %306 = vmatpush.msrb.mxu0 %v1495_v38 }
  0x24   :  { %544 = vmatpush.msrb.mxu3 %v1425_v3  ;;  %434 = vmatpush.msrb.mxu2 %v1491_v37 }
  0x25   :  { %416 = vmatpush.msrb.mxu1 %v1430_v4  ;;  %307 = vmatpush.msrb.mxu0 %v1499_v39 }
  0x26   :  { %545 = vmatpush.msrb.mxu3 %v1430_v4  ;;  %435 = vmatpush.msrb.mxu2 %v1495_v38 }
  0x27   :  { %417 = vmatpush.msrb.mxu1 %v1435_v5  ;;  %308 = vmatpush.msrb.mxu0 %v1503_v40 }
  0x28   :  { %546 = vmatpush.msrb.mxu3 %v1435_v5  ;;  %436 = vmatpush.msrb.mxu2 %v1499_v39 }
  0x29   :  { %418 = vmatpush.msrb.mxu1 %v1440_v6  ;;  %309 = vmatpush.msrb.mxu0 %v1507_v41 }
  0x2a   :  { %547 = vmatpush.msrb.mxu3 %v1440_v6  ;;  %437 = vmatpush.msrb.mxu2 %v1503_v40 }
  0x2b   :  { %419 = vmatpush.msrb.mxu1 %v1445_v7  ;;  %310 = vmatpush.msrb.mxu0 %v1514_v44 }
  0x2c   :  { %548 = vmatpush.msrb.mxu3 %v1445_v7  ;;  %438 = vmatpush.msrb.mxu2 %v1507_v41 }
  0x2d   :  { %561 = vmatpush.msra.mxu0 %v1485_v35 }
  0x2e   :  { %439 = vmatpush.msrb.mxu2 %v1514_v44 }
  0x2f   :  { %562 = vmatpush.msra.mxu0 %v1487_v36 }
  0x31   :  { %563 = vmatpush.msra.mxu0 %v1491_v37 }
  0x33   :  { %564 = vmatpush.msra.mxu0 %v1495_v38 }
  0x35   :  { %565 = vmatpush.msra.mxu0 %v1499_v39 }
  0x37   :  { %566 = vmatpush.msra.mxu0 %v1503_v40 }
  0x39   :  { %567 = vmatpush.msra.mxu0 %v1507_v41 }
  0x3b   :  { %568 = vmatpush.msra.mxu0 %v1514_v44 }
  0x99   :  { %v95_v11 = vpop.f32.mrf.mxu0 }
  0x9a   :  { %v96_v13 = vadd.f32 %v95_v11, %v1476_v10 }
  0x9c   :  { %v99_v14 = vadd.f32 %v98_v12, %v96_v13 }
  0x9e   :  { %1189 = vtanh.f32 %v99_v14  ;;  %v1147_v16 = vmul.f32 -1.442695, %v99_v14 }
  0xa0   :  { %1191 = vpow2.f32 %v1147_v16 }
  0xa4   :  { %v1190_v15 = vpop.eup %1189 }
  0xa5   :  { %122 = vrot.lane.b32.xlu0 %v1190_v15, %s1376_s7 }
  0xa6   :  { %v1192_v17 = vpop.eup %1191 }
  0xa7   :  { %v103_v18 = vadd.f32 1.0, %v1192_v17 }
  0xa9   :  { %1193 = vrcp.f32 %v103_v18  ;;  %v115_v24 = vand.u32 2147483648, %v103_v18  ;;  %vm109_vm1 = vweird.f32 %v103_v18  ;;  %v113_v25 = vand.u32 2147483647, %v103_v18 }
  0xab   :  { %v116_v27 = vor.u32 1.1754944e-38, %v115_v24  ;;  %vm114_vm3 = vcmp.eq.f32.partialorder %v113_v25, 8.507059e+37 }
  0xaf   :  { %v1194_v19 = vpop.eup %1193 }
  0xb0   :  { %v105_v20 = vmul.f32 %v1194_v19, %v103_v18  ;;  %vm110_vm0 = vweird.f32 %v1194_v19 }
  0xb1   :  { %vm111_vm2 = vmor %vm109_vm1, %vm110_vm0 }
  0xb2   :  { %v106_v21 = vsub.f32 1.0, %v105_v20 }
  0xb4   :  { %v107_v22 = vmul.f32 %v1194_v19, %v106_v21 }
  0xb6   :  { %v108_v23 = vadd.f32 %v1194_v19, %v107_v22 }
  0xb8   :  { %v112_v26 = vsel %vm111_vm2, %v1194_v19, %v108_v23 }
  0xb9   :  { %v117_v29 = vsel %vm114_vm3, %v116_v27, %v112_v26 }
  0xba   :  { %v120_v31 = vmul.f32 0.0, %v117_v29 }
 0x117   :  { %v123_v28 = vpop.permute.xlu0 %122 }
 0x118   :  { %v125_v30 = vmul.f32 %v123_v28, %v117_v29 }
 0x11a   :  { %127 = vrot.lane.b32.xlu0 %v125_v30, %s1377_s2 }
 0x18c   :  { %v128_v32 = vpop.permute.xlu0 %127 }
 0x18d   :  { %v1481_v33 = vadd.f32 %v128_v32, %v120_v31 }
 0x18f   :  { %1195 = vtanh.f32 %v1481_v33 }
 0x195   :  { %v1196_v34 = vpop.eup %1195 }
 0x196   :  { %133 = vrot.lane.b32.xlu1 %v1196_v34, %s1376_s7 }
 0x208   :  { %v134_v42 = vpop.permute.xlu1 %133 }
 0x209   :  { %v136_v43 = vmul.f32 %v134_v42, %v117_v29 }
 0x20b   :  { %138 = vrot.lane.b32.xlu1 %v136_v43, %s1377_s2 }
 0x27d   :  { %v139_v45 = vpop.permute.xlu1 %138 }
 0x27e   :  { %v142_v46 = vsel %vm141_vm4, %v139_v45, 0.0 }
 0x27f   :  { %1148 = vmatmul.msk.f32.vlgmr.msra.gmra.mxu1 %vm74_vm5, %v142_v46  ;;  %1149 = vmatmul.msk.f32.vlgmr.msra.gmra.mxu2 %vm74_vm5, %v142_v46 }
 0x280   :  { %670 = vmatpush.msra.mxu1 %v1414_v0  ;;  %690 = vmatpush.msra.mxu2 %v1485_v35 }
 0x282   :  { %671 = vmatpush.msra.mxu1 %v1416_v1  ;;  %691 = vmatpush.msra.mxu2 %v1487_v36 }
 0x284   :  { %672 = vmatpush.msra.mxu1 %v1420_v2  ;;  %692 = vmatpush.msra.mxu2 %v1491_v37 }
 0x286   :  { %673 = vmatpush.msra.mxu1 %v1425_v3  ;;  %693 = vmatpush.msra.mxu2 %v1495_v38 }
 0x288   :  { %674 = vmatpush.msra.mxu1 %v1430_v4  ;;  %694 = vmatpush.msra.mxu2 %v1499_v39 }
 0x28a   :  { %675 = vmatpush.msra.mxu1 %v1435_v5  ;;  %695 = vmatpush.msra.mxu2 %v1503_v40 }
 0x28c   :  { %676 = vmatpush.msra.mxu1 %v1440_v6  ;;  %696 = vmatpush.msra.mxu2 %v1507_v41 }
 0x28e   :  { %677 = vmatpush.msra.mxu1 %v1445_v7  ;;  %697 = vmatpush.msra.mxu2 %v1514_v44 }
 0x2fc   :  { %v163_v47 = vpop.f32.mrf.mxu1 }
 0x2fd   :  { %v164_v49 = vadd.f32 %v163_v47, %v1476_v10 }
 0x2ff   :  { %v188_v50 = vadd.f32 %v187_v48, %v164_v49 }
 0x301   :  { %1197 = vtanh.f32 %v188_v50  ;;  %v1150_v56 = vmul.f32 -1.442695, %v188_v50 }
 0x302   :  { %v183_v52 = vpop.f32.mrf.mxu2 }
 0x303   :  { %v184_v53 = vadd.f32 %v183_v52, %v1555_v51 }
 0x305   :  { %1199 = vtanh.f32 %v184_v53  ;;  %v1151_v57 = vmul.f32 -1.442695, %v184_v53 }
 0x306   :  { %1201 = vpow2.f32 %v1150_v56 }
 0x307   :  { %v1198_v54 = vpop.eup %1197  ;;  %1203 = vpow2.f32 %v1151_v57 }
 0x308   :  { %211 = vrot.lane.b32.xlu2 %v1198_v54, %s1376_s7 }
 0x30b   :  { %v1200_v55 = vpop.eup %1199 }
 0x30c   :  { %v1202_v58 = vpop.eup %1201 }
 0x30d   :  { %v192_v59 = vadd.f32 1.0, %v1202_v58  ;;  %v1204_v60 = vpop.eup %1203  ;;  %v316_v58 = vld [vmem:[#allocation2 + $0x10] sm:$0xff] }
 0x30e   :  { %v229_v61 = vadd.f32 1.0, %v1204_v60 }
 0x30f   :  { %1205 = vrcp.f32 %v192_v59  ;;  %v204_v15 = vand.u32 2147483648, %v192_v59  ;;  %vm198_vm7 = vweird.f32 %v192_v59  ;;  %v202_v16 = vand.u32 2147483647, %v192_v59 }
 0x310   :  { %248 = vrot.lane.b32.xlu2 %v1200_v55, %s1376_s7  ;;  %1207 = vrcp.f32 %v229_v61  ;;  %v241_v24 = vand.u32 2147483648, %v229_v61  ;;  %vm235_vm11 = vweird.f32 %v229_v61  ;;  %v239_v25 = vand.u32 2147483647, %v229_v61 }
 0x311   :  { %v205_v19 = vor.u32 1.1754944e-38, %v204_v15  ;;  %vm203_vm9 = vcmp.eq.f32.partialorder %v202_v16, 8.507059e+37 }
 0x312   :  { %v242_v27 = vor.u32 1.1754944e-38, %v241_v24  ;;  %vm240_vm13 = vcmp.eq.f32.partialorder %v239_v25, 8.507059e+37 }
 0x315   :  { %v1206_v62 = vpop.eup %1205 }
 0x316   :  { %v194_v63 = vmul.f32 %v1206_v62, %v192_v59  ;;  %v1208_v9 = vpop.eup %1207  ;;  %vm199_vm6 = vweird.f32 %v1206_v62 }
 0x317   :  { %v231_v12 = vmul.f32 %v1208_v9, %v229_v61  ;;  %vm200_vm8 = vmor %vm198_vm7, %vm199_vm6  ;;  %vm236_vm10 = vweird.f32 %v1208_v9 }
 0x318   :  { %v195_v8 = vsub.f32 1.0, %v194_v63  ;;  %vm237_vm12 = vmor %vm235_vm11, %vm236_vm10 }
 0x319   :  { %v232_v14 = vsub.f32 1.0, %v231_v12 }
 0x31a   :  { %v196_v11 = vmul.f32 %v1206_v62, %v195_v8 }
 0x31b   :  { %v233_v18 = vmul.f32 %v1208_v9, %v232_v14 }
 0x31c   :  { %v197_v13 = vadd.f32 %v1206_v62, %v196_v11 }
 0x31d   :  { %v234_v23 = vadd.f32 %v1208_v9, %v233_v18 }
 0x31e   :  { %v201_v17 = vsel %vm200_vm8, %v1206_v62, %v197_v13 }
 0x31f   :  { %v206_v21 = vsel %vm203_vm9, %v205_v19, %v201_v17  ;;  %v238_v26 = vsel %vm237_vm12, %v1208_v9, %v234_v23 }
 0x320   :  { %v243_v28 = vsel %vm240_vm13, %v242_v27, %v238_v26  ;;  %v209_v31 = vmul.f32 %v206_v21, %v1481_v33 }
 0x321   :  { %v246_v42 = vmul.f32 0.0, %v243_v28 }
 0x362   :  { %v212_v20 = vpop.permute.xlu2 %211 }
 0x363   :  { %v214_v22 = vmul.f32 %v212_v20, %v206_v21 }
 0x365   :  { %216 = vrot.lane.b32.xlu0 %v214_v22, %s1377_s2 }
 0x36a   :  { %v249_v29 = vpop.permute.xlu2 %248 }
 0x36b   :  { %v251_v30 = vmul.f32 %v249_v29, %v243_v28 }
 0x36d   :  { %253 = vrot.lane.b32.xlu1 %v251_v30, %s1377_s2 }
 0x3d7   :  { %v217_v32 = vpop.permute.xlu0 %216 }
 0x3d8   :  { %v1563_v34 = vadd.f32 %v217_v32, %v209_v31 }
 0x3da   :  { %1209 = vtanh.f32 %v1563_v34 }
 0x3df   :  { %v254_v43 = vpop.permute.xlu1 %253 }
 0x3e0   :  { %v1210_v45 = vpop.eup %1209  ;;  %v1566_v46 = vadd.f32 %v254_v43, %v246_v42 }
 0x3e1   :  { %222 = vrot.lane.b32.xlu2 %v1210_v45, %s1376_s7 }
 0x3e2   :  { %1211 = vtanh.f32 %v1566_v46 }
 0x3e8   :  { %v1212_v47 = vpop.eup %1211 }
 0x3e9   :  { %259 = vrot.lane.b32.xlu0 %v1212_v47, %s1376_s7 }
 0x43b   :  { %v223_v48 = vpop.permute.xlu2 %222 }
 0x43c   :  { %v225_v49 = vmul.f32 %v223_v48, %v206_v21 }
 0x43e   :  { %264 = vrot.lane.b32.xlu1 %v225_v49, %s1377_s2 }
 0x45b   :  { %v260_v33 = vpop.permute.xlu0 %259 }
 0x45c   :  { %v262_v50 = vmul.f32 %v260_v33, %v243_v28 }
 0x45e   :  { %268 = vrot.lane.b32.xlu2 %v262_v50, %s1376_s7 }
 0x4b0   :  { %v265_v52 = vpop.permute.xlu1 %264 }
 0x4b8   :  { %v269_v53 = vpop.permute.xlu2 %268 }
 0x4b9   :  { %v271_v54 = vsel %vm141_vm4, %v265_v52, %v269_v53 }
 0x4ba   :  { %1152 = vmatmul.msk.f32.vlgmr.msra.gmra.mxu3 %vm74_vm5, %v271_v54  ;;  %1153 = vmatmul.msk.f32.vlgmr.msrb.gmra.mxu0 %vm74_vm5, %v271_v54 }
 0x4bb   :  { %799 = vmatpush.msra.mxu3 %v1414_v0  ;;  %819 = vmatpush.msrb.mxu0 %v1485_v35 }
 0x4bd   :  { %800 = vmatpush.msra.mxu3 %v1416_v1  ;;  %820 = vmatpush.msrb.mxu0 %v1487_v36 }
 0x4bf   :  { %801 = vmatpush.msra.mxu3 %v1420_v2  ;;  %821 = vmatpush.msrb.mxu0 %v1491_v37 }
 0x4c1   :  { %802 = vmatpush.msra.mxu3 %v1425_v3  ;;  %822 = vmatpush.msrb.mxu0 %v1495_v38 }
 0x4c3   :  { %803 = vmatpush.msra.mxu3 %v1430_v4  ;;  %823 = vmatpush.msrb.mxu0 %v1499_v39 }
 0x4c5   :  { %804 = vmatpush.msra.mxu3 %v1435_v5  ;;  %824 = vmatpush.msrb.mxu0 %v1503_v40 }
 0x4c7   :  { %805 = vmatpush.msra.mxu3 %v1440_v6  ;;  %825 = vmatpush.msrb.mxu0 %v1507_v41 }
 0x4c9   :  { %806 = vmatpush.msra.mxu3 %v1445_v7  ;;  %826 = vmatpush.msrb.mxu0 %v1514_v44 }
 0x537   :  { %v312_v55 = vpop.f32.mrf.mxu0 }
 0x538   :  { %v313_v56 = vadd.f32 %v312_v55, %v1555_v51 }
 0x53a   :  { %1213 = vtanh.f32 %v313_v56  ;;  %v1155_v63 = vmul.f32 -1.442695, %v313_v56 }
 0x53d   :  { %v292_v57 = vpop.f32.mrf.mxu3 }
 0x53e   :  { %v293_v59 = vadd.f32 %v292_v57, %v1476_v10 }
 0x540   :  { %v1214_v60 = vpop.eup %1213  ;;  %v317_v61 = vadd.f32 %v316_v58, %v293_v59 }
 0x541   :  { %377 = vrot.lane.b32.xlu1 %v1214_v60, %s1376_s7 }
 0x542   :  { %1215 = vtanh.f32 %v317_v61  ;;  %v1154_v8 = vmul.f32 -1.442695, %v317_v61 }
 0x543   :  { %1217 = vpow2.f32 %v1155_v63 }
 0x544   :  { %1219 = vpow2.f32 %v1154_v8 }
 0x548   :  { %v1216_v62 = vpop.eup %1215 }
 0x549   :  { %340 = vrot.lane.b32.xlu0 %v1216_v62, %s1376_s7  ;;  %v1218_v9 = vpop.eup %1217 }
 0x54a   :  { %v358_v11 = vadd.f32 1.0, %v1218_v9  ;;  %v1220_v12 = vpop.eup %1219 }
 0x54b   :  { %v321_v13 = vadd.f32 1.0, %v1220_v12 }
 0x54c   :  { %1221 = vrcp.f32 %v358_v11  ;;  %v370_v22 = vand.u32 2147483648, %v358_v11  ;;  %vm364_vm15 = vweird.f32 %v358_v11  ;;  %v368_v23 = vand.u32 2147483647, %v358_v11 }
 0x54d   :  { %1223 = vrcp.f32 %v321_v13  ;;  %v333_v31 = vand.u32 2147483648, %v321_v13  ;;  %vm327_vm3 = vweird.f32 %v321_v13  ;;  %v331_v32 = vand.u32 2147483647, %v321_v13 }
 0x54e   :  { %v371_v26 = vor.u32 1.1754944e-38, %v370_v22  ;;  %vm369_vm1 = vcmp.eq.f32.partialorder %v368_v23, 8.507059e+37 }
 0x54f   :  { %v334_v43 = vor.u32 1.1754944e-38, %v333_v31  ;;  %vm332_vm7 = vcmp.eq.f32.partialorder %v331_v32, 8.507059e+37 }
 0x552   :  { %v1222_v14 = vpop.eup %1221 }
 0x553   :  { %v360_v15 = vmul.f32 %v1222_v14, %v358_v11  ;;  %v1224_v17 = vpop.eup %1223  ;;  %vm365_vm14 = vweird.f32 %v1222_v14 }
 0x554   :  { %v323_v19 = vmul.f32 %v1224_v17, %v321_v13  ;;  %vm366_vm0 = vmor %vm364_vm15, %vm365_vm14  ;;  %vm328_vm2 = vweird.f32 %v1224_v17 }
 0x555   :  { %v361_v16 = vsub.f32 1.0, %v360_v15  ;;  %vm329_vm6 = vmor %vm327_vm3, %vm328_vm2 }
 0x556   :  { %v324_v21 = vsub.f32 1.0, %v323_v19 }
 0x557   :  { %v362_v18 = vmul.f32 %v1222_v14, %v361_v16 }
 0x558   :  { %v325_v25 = vmul.f32 %v1224_v17, %v324_v21 }
 0x559   :  { %v363_v20 = vadd.f32 %v1222_v14, %v362_v18 }
 0x55a   :  { %v326_v30 = vadd.f32 %v1224_v17, %v325_v25 }
 0x55b   :  { %v367_v24 = vsel %vm366_vm0, %v1222_v14, %v363_v20 }
 0x55c   :  { %v372_v28 = vsel %vm369_vm1, %v371_v26, %v367_v24  ;;  %v330_v42 = vsel %vm329_vm6, %v1224_v17, %v326_v30 }
 0x55d   :  { %v335_v47 = vsel %vm332_vm7, %v334_v43, %v330_v42  ;;  %v375_v53 = vmul.f32 %v372_v28, %v1566_v46 }
 0x55e   :  { %v338_v49 = vmul.f32 %v335_v47, %v1563_v34 }
 0x5b3   :  { %v378_v27 = vpop.permute.xlu1 %377 }
 0x5b4   :  { %v380_v29 = vmul.f32 %v378_v27, %v372_v28 }
 0x5b6   :  { %382 = vrot.lane.b32.xlu0 %v380_v29, %s1377_s2 }
 0x5bb   :  { %v341_v45 = vpop.permute.xlu0 %340 }
 0x5bc   :  { %v343_v48 = vmul.f32 %v341_v45, %v335_v47 }
 0x5be   :  { %345 = vrot.lane.b32.xlu2 %v343_v48, %s1377_s2 }
 0x618   :  { %v346_v33 = vpop.permute.xlu2 %345 }
 0x619   :  { %v1599_v50 = vadd.f32 %v346_v33, %v338_v49 }
 0x61b   :  { %1225 = vtanh.f32 %v1599_v50 }
 0x621   :  { %v1226_v52 = vpop.eup %1225 }
 0x622   :  { %351 = vrot.lane.b32.xlu1 %v1226_v52, %s1376_s7 }
 0x628   :  { %v383_v54 = vpop.permute.xlu0 %382 }
 0x629   :  { %v1604_v55 = vadd.f32 %v383_v54, %v375_v53 }
 0x62b   :  { %1227 = vtanh.f32 %v1604_v55 }
 0x631   :  { %v1228_v56 = vpop.eup %1227 }
 0x632   :  { %388 = vrot.lane.b32.xlu2 %v1228_v56, %s1376_s7 }
 0x68c   :  { %v389_v57 = vpop.permute.xlu2 %388 }
 0x68d   :  { %v391_v34 = vmul.f32 %v389_v57, %v372_v28 }
 0x68f   :  { %397 = vrot.lane.b32.xlu1 %v391_v34, %s1376_s7 }
 0x694   :  { %v352_v58 = vpop.permute.xlu1 %351 }
 0x695   :  { %v354_v59 = vmul.f32 %v352_v58, %v335_v47 }
 0x697   :  { %393 = vrot.lane.b32.xlu0 %v354_v59, %s1377_s2 }
 0x701   :  { %v398_v60 = vpop.permute.xlu1 %397 }
 0x709   :  { %v394_v61 = vpop.permute.xlu0 %393 }
 0x70a   :  { %v400_v46 = vsel %vm141_vm4, %v394_v61, %v398_v60 }
 0x70b   :  { %1156 = vmatmul.msk.f32.vlgmr.msrb.gmra.mxu1 %vm74_vm5, %v400_v46  ;;  %1157 = vmatmul.msk.f32.vlgmr.msrb.gmra.mxu2 %vm74_vm5, %v400_v46 }
 0x70c   :  { %928 = vmatpush.msrb.mxu1 %v1414_v0  ;;  %948 = vmatpush.msrb.mxu2 %v1485_v35 }
 0x70e   :  { %929 = vmatpush.msrb.mxu1 %v1416_v1  ;;  %949 = vmatpush.msrb.mxu2 %v1487_v36  ;;  %v445_v1 = vld [vmem:[#allocation2 + $0x18] sm:$0xff] }
 0x710   :  { %930 = vmatpush.msrb.mxu1 %v1420_v2  ;;  %950 = vmatpush.msrb.mxu2 %v1491_v37 }
 0x712   :  { %931 = vmatpush.msrb.mxu1 %v1425_v3  ;;  %951 = vmatpush.msrb.mxu2 %v1495_v38 }
 0x714   :  { %932 = vmatpush.msrb.mxu1 %v1430_v4  ;;  %952 = vmatpush.msrb.mxu2 %v1499_v39 }
 0x716   :  { %933 = vmatpush.msrb.mxu1 %v1435_v5  ;;  %953 = vmatpush.msrb.mxu2 %v1503_v40 }
 0x718   :  { %934 = vmatpush.msrb.mxu1 %v1440_v6  ;;  %954 = vmatpush.msrb.mxu2 %v1507_v41 }
 0x71a   :  { %935 = vmatpush.msrb.mxu1 %v1445_v7  ;;  %955 = vmatpush.msrb.mxu2 %v1514_v44 }
 0x788   :  { %v421_v0 = vpop.f32.mrf.mxu1 }
 0x789   :  { %v422_v2 = vadd.f32 %v421_v0, %v1476_v10 }
 0x78b   :  { %v446_v3 = vadd.f32 %v445_v1, %v422_v2 }
 0x78d   :  { %1229 = vtanh.f32 %v446_v3  ;;  %v1158_v63 = vmul.f32 -1.442695, %v446_v3 }
 0x78e   :  { %v441_v4 = vpop.f32.mrf.mxu2 }
 0x78f   :  { %v442_v62 = vadd.f32 %v441_v4, %v1555_v51 }
 0x791   :  { %1231 = vtanh.f32 %v442_v62  ;;  %v1159_v12 = vmul.f32 -1.442695, %v442_v62 }
 0x792   :  { %1233 = vpow2.f32 %v1158_v63 }
 0x793   :  { %v1230_v5 = vpop.eup %1229 }
 0x794   :  { %469 = vrot.lane.b32.xlu2 %v1230_v5, %s1376_s7 }
 0x797   :  { %v1232_v6 = vpop.eup %1231 }
 0x798   :  { %506 = vrot.lane.b32.xlu0 %v1232_v6, %s1376_s7  ;;  %v1234_v7 = vpop.eup %1233 }
 0x799   :  { %v450_v8 = vadd.f32 1.0, %v1234_v7 }
 0x79b   :  { %1235 = vrcp.f32 %v450_v8  ;;  %v462_v17 = vand.u32 2147483648, %v450_v8  ;;  %vm456_vm9 = vweird.f32 %v450_v8  ;;  %v460_v18 = vand.u32 2147483647, %v450_v8 }
 0x79c   :  { %1237 = vpow2.f32 %v1159_v12 }
 0x79d   :  { %v463_v21 = vor.u32 1.1754944e-38, %v462_v17  ;;  %vm461_vm11 = vcmp.eq.f32.partialorder %v460_v18, 8.507059e+37 }
 0x7a1   :  { %v1236_v9 = vpop.eup %1235 }
 0x7a2   :  { %v452_v11 = vmul.f32 %v1236_v9, %v450_v8  ;;  %v1238_v15 = vpop.eup %1237  ;;  %vm457_vm8 = vweird.f32 %v1236_v9 }
 0x7a3   :  { %v487_v19 = vadd.f32 1.0, %v1238_v15  ;;  %vm458_vm10 = vmor %vm456_vm9, %vm457_vm8 }
 0x7a4   :  { %v453_v13 = vsub.f32 1.0, %v452_v11 }
 0x7a5   :  { %1239 = vrcp.f32 %v487_v19  ;;  %v499_v30 = vand.u32 2147483648, %v487_v19  ;;  %vm493_vm13 = vweird.f32 %v487_v19  ;;  %v497_v31 = vand.u32 2147483647, %v487_v19 }
 0x7a6   :  { %v454_v14 = vmul.f32 %v1236_v9, %v453_v13 }
 0x7a7   :  { %v500_v42 = vor.u32 1.1754944e-38, %v499_v30  ;;  %vm498_vm15 = vcmp.eq.f32.partialorder %v497_v31, 8.507059e+37 }
 0x7a8   :  { %v455_v16 = vadd.f32 %v1236_v9, %v454_v14 }
 0x7aa   :  { %v459_v20 = vsel %vm458_vm10, %v1236_v9, %v455_v16 }
 0x7ab   :  { %v464_v23 = vsel %vm461_vm11, %v463_v21, %v459_v20  ;;  %v1240_v25 = vpop.eup %1239 }
 0x7ac   :  { %v489_v26 = vmul.f32 %v1240_v25, %v487_v19  ;;  %vm494_vm12 = vweird.f32 %v1240_v25  ;;  %v467_v48 = vmul.f32 %v464_v23, %v1599_v50 }
 0x7ad   :  { %vm495_vm14 = vmor %vm493_vm13, %vm494_vm12 }
 0x7ae   :  { %v490_v27 = vsub.f32 1.0, %v489_v26 }
 0x7b0   :  { %v491_v28 = vmul.f32 %v1240_v25, %v490_v27 }
 0x7b2   :  { %v492_v29 = vadd.f32 %v1240_v25, %v491_v28 }
 0x7b4   :  { %v496_v32 = vsel %vm495_vm14, %v1240_v25, %v492_v29 }
 0x7b5   :  { %v501_v45 = vsel %vm498_vm15, %v500_v42, %v496_v32 }
 0x7b6   :  { %v504_v52 = vmul.f32 %v501_v45, %v1604_v55 }
 0x7ee   :  { %v470_v22 = vpop.permute.xlu2 %469 }
 0x7ef   :  { %v472_v24 = vmul.f32 %v470_v22, %v464_v23 }
 0x7f1   :  { %474 = vrot.lane.b32.xlu1 %v472_v24, %s1377_s2 }
 0x80a   :  { %v507_v43 = vpop.permute.xlu0 %506 }
 0x80b   :  { %v509_v47 = vmul.f32 %v507_v43, %v501_v45 }
 0x80d   :  { %511 = vrot.lane.b32.xlu2 %v509_v47, %s1377_s2 }
 0x863   :  { %v475_v49 = vpop.permute.xlu1 %474 }
 0x864   :  { %v1636_v33 = vadd.f32 %v475_v49, %v467_v48 }
 0x866   :  { %1241 = vtanh.f32 %v1636_v33 }
 0x867   :  { %v512_v53 = vpop.permute.xlu2 %511 }
 0x868   :  { %v1640_v54 = vadd.f32 %v512_v53, %v504_v52 }
 0x86a   :  { %1243 = vtanh.f32 %v1640_v54 }
 0x86c   :  { %v1242_v56 = vpop.eup %1241 }
 0x86d   :  { %480 = vrot.lane.b32.xlu0 %v1242_v56, %s1376_s7 }
 0x870   :  { %v1244_v57 = vpop.eup %1243 }
 0x871   :  { %517 = vrot.lane.b32.xlu1 %v1244_v57, %s1376_s7  ;;  %v703_v57 = vld [vmem:[#allocation2 + $0x28] sm:$0xff] }
 0x8df   :  { %v481_v34 = vpop.permute.xlu0 %480 }
 0x8e0   :  { %v483_v50 = vmul.f32 %v481_v34, %v464_v23 }
 0x8e2   :  { %522 = vrot.lane.b32.xlu2 %v483_v50, %s1377_s2 }
 0x8e3   :  { %v518_v58 = vpop.permute.xlu1 %517 }
 0x8e4   :  { %v520_v59 = vmul.f32 %v518_v58, %v501_v45 }
 0x8e6   :  { %526 = vrot.lane.b32.xlu0 %v520_v59, %s1376_s7 }
 0x93c   :  { %v523_v55 = vpop.permute.xlu2 %522 }
 0x958   :  { %v527_v60 = vpop.permute.xlu0 %526 }
 0x959   :  { %v529_v61 = vsel %vm141_vm4, %v523_v55, %v527_v60 }
 0x95a   :  { %1160 = vmatmul.msk.f32.vlgmr.msrb.gmra.mxu3 %vm74_vm5, %v529_v61  ;;  %1161 = vmatmul.msk.f32.vlgmr.msra.gmra.mxu0 %vm74_vm5, %v529_v61 }
 0x95b   :  { %1057 = vmatpush.msrb.mxu3 %v1485_v35  ;;  %v574_v35 = vld [vmem:[#allocation2 + $0x20] sm:$0xff] }
 0x95d   :  { %1058 = vmatpush.msrb.mxu3 %v1487_v36 }
 0x95f   :  { %1059 = vmatpush.msrb.mxu3 %v1491_v37 }
 0x961   :  { %1060 = vmatpush.msrb.mxu3 %v1495_v38 }
 0x963   :  { %1061 = vmatpush.msrb.mxu3 %v1499_v39 }
 0x965   :  { %1062 = vmatpush.msrb.mxu3 %v1503_v40 }
 0x967   :  { %1063 = vmatpush.msrb.mxu3 %v1507_v41 }
 0x969   :  { %1064 = vmatpush.msrb.mxu3 %v1514_v44 }
 0x9d7   :  { %v570_v46 = vpop.f32.mrf.mxu0 }
 0x9d8   :  { %v571_v0 = vadd.f32 %v570_v46, %v1555_v51 }
 0x9da   :  { %1245 = vtanh.f32 %v571_v0  ;;  %v1163_v39 = vmul.f32 -1.442695, %v571_v0 }
 0x9dd   :  { %v550_v1 = vpop.f32.mrf.mxu3 }
 0x9de   :  { %v551_v36 = vadd.f32 %v550_v1, %v1476_v10 }
 0x9e0   :  { %v1246_v2 = vpop.eup %1245  ;;  %v575_v37 = vadd.f32 %v574_v35, %v551_v36 }
 0x9e1   :  { %635 = vrot.lane.b32.xlu2 %v1246_v2, %s1376_s7 }
 0x9e2   :  { %1247 = vtanh.f32 %v575_v37  ;;  %v1162_v62 = vmul.f32 -1.442695, %v575_v37 }
 0x9e3   :  { %1249 = vpow2.f32 %v1163_v39 }
 0x9e8   :  { %v1248_v38 = vpop.eup %1247 }
 0x9e9   :  { %598 = vrot.lane.b32.xlu1 %v1248_v38, %s1376_s7  ;;  %v1250_v40 = vpop.eup %1249 }
 0x9ea   :  { %v616_v41 = vadd.f32 1.0, %v1250_v40 }
 0x9ec   :  { %1251 = vrcp.f32 %v616_v41  ;;  %v628_v63 = vand.u32 2147483648, %v616_v41  ;;  %vm622_vm1 = vweird.f32 %v616_v41  ;;  %v626_v7 = vand.u32 2147483647, %v616_v41 }
 0x9ed   :  { %1253 = vpow2.f32 %v1162_v62 }
 0x9ee   :  { %v629_v11 = vor.u32 1.1754944e-38, %v628_v63  ;;  %vm627_vm3 = vcmp.eq.f32.partialorder %v626_v7, 8.507059e+37 }
 0x9f2   :  { %v1252_v44 = vpop.eup %1251 }
 0x9f3   :  { %v618_v3 = vmul.f32 %v1252_v44, %v616_v41  ;;  %vm623_vm0 = vweird.f32 %v1252_v44  ;;  %v1254_v8 = vpop.eup %1253 }
 0x9f4   :  { %vm624_vm2 = vmor %vm622_vm1, %vm623_vm0  ;;  %v579_v12 = vadd.f32 1.0, %v1254_v8 }
 0x9f5   :  { %v619_v4 = vsub.f32 1.0, %v618_v3 }
 0x9f6   :  { %1255 = vrcp.f32 %v579_v12  ;;  %v591_v21 = vand.u32 2147483648, %v579_v12  ;;  %vm585_vm7 = vweird.f32 %v579_v12  ;;  %v589_v22 = vand.u32 2147483647, %v579_v12 }
 0x9f7   :  { %v620_v5 = vmul.f32 %v1252_v44, %v619_v4 }
 0x9f8   :  { %v592_v24 = vor.u32 1.1754944e-38, %v591_v21  ;;  %vm590_vm9 = vcmp.eq.f32.partialorder %v589_v22, 8.507059e+37 }
 0x9f9   :  { %v621_v6 = vadd.f32 %v1252_v44, %v620_v5 }
 0x9fb   :  { %v625_v9 = vsel %vm624_vm2, %v1252_v44, %v621_v6 }
 0x9fc   :  { %v630_v14 = vsel %vm627_vm3, %v629_v11, %v625_v9  ;;  %v1256_v16 = vpop.eup %1255 }
 0x9fd   :  { %v581_v17 = vmul.f32 %v1256_v16, %v579_v12  ;;  %vm586_vm6 = vweird.f32 %v1256_v16  ;;  %v633_v28 = vmul.f32 %v630_v14, %v1640_v54 }
 0x9fe   :  { %vm587_vm8 = vmor %vm585_vm7, %vm586_vm6 }
 0x9ff   :  { %v582_v18 = vsub.f32 1.0, %v581_v17 }
 0xa01   :  { %v583_v19 = vmul.f32 %v1256_v16, %v582_v18 }
 0xa03   :  { %v584_v20 = vadd.f32 %v1256_v16, %v583_v19 }
 0xa05   :  { %v588_v23 = vsel %vm587_vm8, %v1256_v16, %v584_v20 }
 0xa06   :  { %v593_v26 = vsel %vm590_vm9, %v592_v24, %v588_v23 }
 0xa07   :  { %v596_v32 = vmul.f32 %v593_v26, %v1636_v33 }
 0xa3b   :  { %v636_v13 = vpop.permute.xlu2 %635 }
 0xa3c   :  { %v638_v15 = vmul.f32 %v636_v13, %v630_v14 }
 0xa3e   :  { %640 = vrot.lane.b32.xlu1 %v638_v15, %s1377_s2 }
 0xa5b   :  { %v599_v25 = vpop.permute.xlu1 %598 }
 0xa5c   :  { %v601_v27 = vmul.f32 %v599_v25, %v593_v26 }
 0xa5e   :  { %603 = vrot.lane.b32.xlu0 %v601_v27, %s1377_s2 }
 0xab0   :  { %v641_v29 = vpop.permute.xlu1 %640 }
 0xab1   :  { %v1665_v30 = vadd.f32 %v641_v29, %v633_v28 }
 0xab3   :  { %1257 = vtanh.f32 %v1665_v30 }
 0xab9   :  { %v1258_v31 = vpop.eup %1257 }
 0xaba   :  { %646 = vrot.lane.b32.xlu0 %v1258_v31, %s1376_s7 }
 0xad0   :  { %v604_v42 = vpop.permute.xlu0 %603 }
 0xad1   :  { %v1670_v43 = vadd.f32 %v604_v42, %v596_v32 }
 0xad3   :  { %1259 = vtanh.f32 %v1670_v43 }
 0xad9   :  { %v1260_v45 = vpop.eup %1259 }
 0xada   :  { %609 = vrot.lane.b32.xlu2 %v1260_v45, %s1376_s7 }
 0xb2c   :  { %v647_v47 = vpop.permute.xlu0 %646 }
 0xb2d   :  { %v649_v48 = vmul.f32 %v647_v47, %v630_v14 }
 0xb2f   :  { %655 = vrot.lane.b32.xlu2 %v649_v48, %s1376_s7  ;;  %v832_v48 = vld [vmem:[#allocation2 + $0x30] sm:$0xff] }
 0xb34   :  { %v610_v49 = vpop.permute.xlu2 %609 }
 0xb35   :  { %v612_v52 = vmul.f32 %v610_v49, %v593_v26 }
 0xb37   :  { %651 = vrot.lane.b32.xlu1 %v612_v52, %s1377_s2 }
 0xb89   :  { %v656_v53 = vpop.permute.xlu2 %655 }
 0xba9   :  { %v652_v54 = vpop.permute.xlu1 %651 }
 0xbaa   :  { %v658_v33 = vsel %vm141_vm4, %v652_v54, %v656_v53 }
 0xbab   :  { %1164 = vmatmul.msk.f32.vlgmr.msra.gmra.mxu1 %vm74_vm5, %v658_v33  ;;  %1165 = vmatmul.msk.f32.vlgmr.msra.gmra.mxu2 %vm74_vm5, %v658_v33 }
 0xc28   :  { %v679_v56 = vpop.f32.mrf.mxu1 }
 0xc29   :  { %v680_v34 = vadd.f32 %v679_v56, %v1476_v10 }
 0xc2b   :  { %v704_v50 = vadd.f32 %v703_v57, %v680_v34 }
 0xc2d   :  { %1261 = vtanh.f32 %v704_v50  ;;  %v1166_v61 = vmul.f32 -1.442695, %v704_v50 }
 0xc2e   :  { %v699_v58 = vpop.f32.mrf.mxu2 }
 0xc2f   :  { %v700_v59 = vadd.f32 %v699_v58, %v1555_v51 }
 0xc31   :  { %1263 = vtanh.f32 %v700_v59  ;;  %v1167_v46 = vmul.f32 -1.442695, %v700_v59 }
 0xc32   :  { %1265 = vpow2.f32 %v1166_v61 }
 0xc33   :  { %v1262_v55 = vpop.eup %1261  ;;  %1267 = vpow2.f32 %v1167_v46 }
 0xc34   :  { %727 = vrot.lane.b32.xlu0 %v1262_v55, %s1376_s7 }
 0xc37   :  { %v1264_v60 = vpop.eup %1263 }
 0xc38   :  { %764 = vrot.lane.b32.xlu1 %v1264_v60, %s1376_s7  ;;  %v1266_v0 = vpop.eup %1265 }
 0xc39   :  { %v708_v1 = vadd.f32 1.0, %v1266_v0  ;;  %v1268_v35 = vpop.eup %1267 }
 0xc3a   :  { %v745_v36 = vadd.f32 1.0, %v1268_v35 }
 0xc3b   :  { %1269 = vrcp.f32 %v708_v1  ;;  %v720_v62 = vand.u32 2147483648, %v708_v1  ;;  %vm714_vm11 = vweird.f32 %v708_v1  ;;  %v718_v5 = vand.u32 2147483647, %v708_v1 }
 0xc3c   :  { %1271 = vrcp.f32 %v745_v36  ;;  %v757_v8 = vand.u32 2147483648, %v745_v36  ;;  %vm751_vm15 = vweird.f32 %v745_v36  ;;  %v755_v9 = vand.u32 2147483647, %v745_v36 }
 0xc3d   :  { %v721_v7 = vor.u32 1.1754944e-38, %v720_v62  ;;  %vm719_vm14 = vcmp.eq.f32.partialorder %v718_v5, 8.507059e+37 }
 0xc3e   :  { %v758_v15 = vor.u32 1.1754944e-38, %v757_v8  ;;  %vm756_vm1 = vcmp.eq.f32.partialorder %v755_v9, 8.507059e+37 }
 0xc41   :  { %v1270_v2 = vpop.eup %1269 }
 0xc42   :  { %v710_v37 = vmul.f32 %v1270_v2, %v708_v1  ;;  %v1272_v38 = vpop.eup %1271  ;;  %vm715_vm10 = vweird.f32 %v1270_v2 }
 0xc43   :  { %v747_v40 = vmul.f32 %v1272_v38, %v745_v36  ;;  %vm716_vm12 = vmor %vm714_vm11, %vm715_vm10  ;;  %vm752_vm13 = vweird.f32 %v1272_v38 }
 0xc44   :  { %v711_v39 = vsub.f32 1.0, %v710_v37  ;;  %vm753_vm0 = vmor %vm751_vm15, %vm752_vm13 }
 0xc45   :  { %v748_v44 = vsub.f32 1.0, %v747_v40 }
 0xc46   :  { %v712_v41 = vmul.f32 %v1270_v2, %v711_v39 }
 0xc47   :  { %v749_v4 = vmul.f32 %v1272_v38, %v748_v44 }
 0xc48   :  { %v713_v3 = vadd.f32 %v1270_v2, %v712_v41 }
 0xc49   :  { %v750_v63 = vadd.f32 %v1272_v38, %v749_v4 }
 0xc4a   :  { %v717_v6 = vsel %vm716_vm12, %v1270_v2, %v713_v3 }
 0xc4b   :  { %v722_v12 = vsel %vm719_vm14, %v721_v7, %v717_v6  ;;  %v754_v14 = vsel %vm753_vm0, %v1272_v38, %v750_v63 }
 0xc4c   :  { %v759_v17 = vsel %vm756_vm1, %v758_v15, %v754_v14  ;;  %v725_v19 = vmul.f32 %v722_v12, %v1670_v43 }
 0xc4d   :  { %v762_v23 = vmul.f32 %v759_v17, %v1665_v30 }
 0xca6   :  { %v728_v11 = vpop.permute.xlu0 %727 }
 0xca7   :  { %v730_v13 = vmul.f32 %v728_v11, %v722_v12 }
 0xca9   :  { %732 = vrot.lane.b32.xlu2 %v730_v13, %s1377_s2 }
 0xcaa   :  { %v765_v16 = vpop.permute.xlu1 %764 }
 0xcab   :  { %v767_v18 = vmul.f32 %v765_v16, %v759_v17 }
 0xcad   :  { %769 = vrot.lane.b32.xlu0 %v767_v18, %s1377_s2 }
 0xd03   :  { %v733_v20 = vpop.permute.xlu2 %732 }
 0xd04   :  { %v1686_v21 = vadd.f32 %v733_v20, %v725_v19 }
 0xd06   :  { %1273 = vtanh.f32 %v1686_v21 }
 0xd0c   :  { %v1274_v22 = vpop.eup %1273 }
 0xd0d   :  { %738 = vrot.lane.b32.xlu1 %v1274_v22, %s1376_s7 }
 0xd1f   :  { %v770_v24 = vpop.permute.xlu0 %769 }
 0xd20   :  { %v1691_v25 = vadd.f32 %v770_v24, %v762_v23 }
 0xd22   :  { %1275 = vtanh.f32 %v1691_v25 }
 0xd28   :  { %v1276_v26 = vpop.eup %1275 }
 0xd29   :  { %775 = vrot.lane.b32.xlu2 %v1276_v26, %s1376_s7  ;;  %v961_v26 = vld [vmem:[#allocation2 + $0x38] sm:$0xff] }
 0xd7f   :  { %v739_v27 = vpop.permute.xlu1 %738 }
 0xd80   :  { %v741_v28 = vmul.f32 %v739_v27, %v722_v12 }
 0xd82   :  { %780 = vrot.lane.b32.xlu0 %v741_v28, %s1377_s2 }
 0xd83   :  { %v776_v29 = vpop.permute.xlu2 %775 }
 0xd84   :  { %v778_v31 = vmul.f32 %v776_v29, %v759_v17 }
 0xd86   :  { %784 = vrot.lane.b32.xlu1 %v778_v31, %s1376_s7 }
 0xdf4   :  { %v781_v32 = vpop.permute.xlu0 %780 }
 0xdf8   :  { %v785_v42 = vpop.permute.xlu1 %784 }
 0xdf9   :  { %v787_v30 = vsel %vm141_vm4, %v781_v32, %v785_v42 }
 0xdfa   :  { %1168 = vmatmul.msk.f32.vlgmr.msra.gmra.mxu3 %vm74_vm5, %v787_v30  ;;  %1169 = vmatmul.msk.f32.vlgmr.msrb.gmra.mxu0 %vm74_vm5, %v787_v30 }
 0xe77   :  { %v828_v43 = vpop.f32.mrf.mxu0 }
 0xe78   :  { %v829_v45 = vadd.f32 %v828_v43, %v1555_v51 }
 0xe7a   :  { %1277 = vtanh.f32 %v829_v45  ;;  %v1171_v34 = vmul.f32 -1.442695, %v829_v45 }
 0xe7d   :  { %v808_v47 = vpop.f32.mrf.mxu3 }
 0xe7e   :  { %v809_v49 = vadd.f32 %v808_v47, %v1476_v10 }
 0xe80   :  { %v1278_v52 = vpop.eup %1277  ;;  %v833_v53 = vadd.f32 %v832_v48, %v809_v49 }
 0xe81   :  { %893 = vrot.lane.b32.xlu0 %v1278_v52, %s1376_s7 }
 0xe82   :  { %1279 = vtanh.f32 %v833_v53  ;;  %v1170_v33 = vmul.f32 -1.442695, %v833_v53 }
 0xe84   :  { %1281 = vpow2.f32 %v1170_v33 }
 0xe88   :  { %v1280_v54 = vpop.eup %1279 }
 0xe89   :  { %856 = vrot.lane.b32.xlu2 %v1280_v54, %s1376_s7 }
 0xe8a   :  { %v1282_v56 = vpop.eup %1281 }
 0xe8b   :  { %v837_v57 = vadd.f32 1.0, %v1282_v56 }
 0xe8d   :  { %1283 = vrcp.f32 %v837_v57  ;;  %v849_v1 = vand.u32 2147483648, %v837_v57  ;;  %vm843_vm3 = vweird.f32 %v837_v57  ;;  %v847_v35 = vand.u32 2147483647, %v837_v57 }
 0xe8e   :  { %1285 = vpow2.f32 %v1171_v34 }
 0xe8f   :  { %v850_v37 = vor.u32 1.1754944e-38, %v849_v1  ;;  %vm848_vm7 = vcmp.eq.f32.partialorder %v847_v35, 8.507059e+37 }
 0xe93   :  { %v1284_v50 = vpop.eup %1283 }
 0xe94   :  { %v1286_v58 = vpop.eup %1285  ;;  %v839_v59 = vmul.f32 %v1284_v50, %v837_v57  ;;  %vm844_vm2 = vweird.f32 %v1284_v50 }
 0xe95   :  { %v874_v55 = vadd.f32 1.0, %v1286_v58  ;;  %vm845_vm6 = vmor %vm843_vm3, %vm844_vm2 }
 0xe96   :  { %v840_v60 = vsub.f32 1.0, %v839_v59 }
 0xe97   :  { %1287 = vrcp.f32 %v874_v55  ;;  %v886_v4 = vand.u32 2147483648, %v874_v55  ;;  %vm880_vm9 = vweird.f32 %v874_v55  ;;  %v884_v62 = vand.u32 2147483647, %v874_v55 }
 0xe98   :  { %v841_v61 = vmul.f32 %v1284_v50, %v840_v60 }
 0xe99   :  { %v887_v6 = vor.u32 1.1754944e-38, %v886_v4  ;;  %vm885_vm11 = vcmp.eq.f32.partialorder %v884_v62, 8.507059e+37 }
 0xe9a   :  { %v842_v46 = vadd.f32 %v1284_v50, %v841_v61 }
 0xe9c   :  { %v846_v36 = vsel %vm845_vm6, %v1284_v50, %v842_v46 }
 0xe9d   :  { %v1288_v0 = vpop.eup %1287  ;;  %v851_v39 = vsel %vm848_vm7, %v850_v37, %v846_v36 }
 0xe9e   :  { %v876_v2 = vmul.f32 %v1288_v0, %v874_v55  ;;  %vm881_vm8 = vweird.f32 %v1288_v0  ;;  %v854_v13 = vmul.f32 %v851_v39, %v1686_v21 }
 0xe9f   :  { %vm882_vm10 = vmor %vm880_vm9, %vm881_vm8  ;;  %vm1139_vm9 = vcmask 31744  }
 0xea0   :  { %v877_v41 = vsub.f32 1.0, %v876_v2 }
 0xea2   :  { %v878_v44 = vmul.f32 %v1288_v0, %v877_v41 }
 0xea4   :  { %v879_v3 = vadd.f32 %v1288_v0, %v878_v44 }
 0xea6   :  { %v883_v5 = vsel %vm882_vm10, %v1288_v0, %v879_v3 }
 0xea7   :  { %v888_v7 = vsel %vm885_vm11, %v887_v6, %v883_v5 }
 0xea8   :  { %v891_v9 = vmul.f32 %v888_v7, %v1691_v25 }
 0xee3   :  { %v857_v38 = vpop.permute.xlu2 %856 }
 0xee4   :  { %v859_v40 = vmul.f32 %v857_v38, %v851_v39 }
 0xee6   :  { %861 = vrot.lane.b32.xlu1 %v859_v40, %s1377_s2 }
 0xef3   :  { %v894_v63 = vpop.permute.xlu0 %893 }
 0xef4   :  { %v896_v8 = vmul.f32 %v894_v63, %v888_v7 }
 0xef6   :  { %898 = vrot.lane.b32.xlu2 %v896_v8, %s1377_s2 }
 0xf50   :  { %v899_v11 = vpop.permute.xlu2 %898 }
 0xf51   :  { %v1707_v12 = vadd.f32 %v899_v11, %v891_v9 }
 0xf53   :  { %1289 = vtanh.f32 %v1707_v12 }
 0xf58   :  { %v862_v14 = vpop.permute.xlu1 %861 }
 0xf59   :  { %v1290_v15 = vpop.eup %1289  ;;  %v1711_v16 = vadd.f32 %v862_v14, %v854_v13 }
 0xf5a   :  { %904 = vrot.lane.b32.xlu1 %v1290_v15, %s1376_s7 }
 0xf5b   :  { %1291 = vtanh.f32 %v1711_v16 }
 0xf61   :  { %v1292_v17 = vpop.eup %1291 }
 0xf62   :  { %867 = vrot.lane.b32.xlu0 %v1292_v17, %s1376_s7 }
 0xfcc   :  { %v905_v18 = vpop.permute.xlu1 %904 }
 0xfcd   :  { %v907_v19 = vmul.f32 %v905_v18, %v888_v7 }
 0xfcf   :  { %913 = vrot.lane.b32.xlu0 %v907_v19, %s1376_s7 }
 0xfd4   :  { %v868_v20 = vpop.permute.xlu0 %867 }
 0xfd5   :  { %v870_v22 = vmul.f32 %v868_v20, %v851_v39 }
 0xfd7   :  { %909 = vrot.lane.b32.xlu2 %v870_v22, %s1377_s2 }
0x1031   :  { %v910_v21 = vpop.permute.xlu2 %909 }
0x1041   :  { %v914_v23 = vpop.permute.xlu0 %913 }
0x1042   :  { %v916_v24 = vsel %vm141_vm4, %v910_v21, %v914_v23 }
0x1043   :  { %1172 = vmatmul.msk.f32.vlgmr.msrb.gmra.mxu1 %vm74_vm5, %v916_v24  ;;  %1173 = vmatmul.msk.f32.vlgmr.msrb.gmra.mxu2 %vm74_vm5, %v916_v24 }
0x10c0   :  { %v937_v25 = vpop.f32.mrf.mxu1 }
0x10c1   :  { %v938_v27 = vadd.f32 %v937_v25, %v1476_v10 }
0x10c3   :  { %v962_v28 = vadd.f32 %v961_v26, %v938_v27 }
0x10c5   :  { %1293 = vtanh.f32 %v962_v28  ;;  %v1174_v47 = vmul.f32 -1.442695, %v962_v28 }
0x10c6   :  { %v957_v29 = vpop.f32.mrf.mxu2 }
0x10c7   :  { %v958_v31 = vadd.f32 %v957_v29, %v1555_v51 }
0x10c9   :  { %1295 = vtanh.f32 %v958_v31  ;;  %v1175_v30 = vmul.f32 -1.442695, %v958_v31 }
0x10cb   :  { %v1294_v32 = vpop.eup %1293  ;;  %1297 = vpow2.f32 %v1175_v30 }
0x10cc   :  { %985 = vrot.lane.b32.xlu1 %v1294_v32, %s1376_s7 }
0x10cf   :  { %v1296_v42 = vpop.eup %1295 }
0x10d0   :  { %1022 = vrot.lane.b32.xlu2 %v1296_v42, %s1376_s7 }
0x10d1   :  { %v1298_v43 = vpop.eup %1297 }
0x10d2   :  { %v1003_v45 = vadd.f32 1.0, %v1298_v43 }
0x10d4   :  { %1299 = vrcp.f32 %v1003_v45  ;;  %v1015_v56 = vand.u32 2147483648, %v1003_v45  ;;  %vm1009_vm13 = vweird.f32 %v1003_v45  ;;  %v1013_v57 = vand.u32 2147483647, %v1003_v45 }
0x10d5   :  { %1301 = vpow2.f32 %v1174_v47  ;;  %v1109_v47 = vld [vmem:[%s1762_s3 + $0x18] sm:$0xff] }
0x10d6   :  { %v1016_v58 = vor.u32 1.1754944e-38, %v1015_v56  ;;  %vm1014_vm15 = vcmp.eq.f32.partialorder %v1013_v57, 8.507059e+37  ;;  %1131 = vmatpush.msra.mxu0 %v1109_v47 }
0x10da   :  { %v1300_v48 = vpop.eup %1299 }
0x10db   :  { %v1005_v10 = vmul.f32 %v1300_v48, %v1003_v45  ;;  %v1302_v49 = vpop.eup %1301  ;;  %vm1010_vm12 = vweird.f32 %v1300_v48 }
0x10dc   :  { %v966_v53 = vadd.f32 1.0, %v1302_v49  ;;  %vm1011_vm14 = vmor %vm1009_vm13, %vm1010_vm12  ;;  %v1106_v49 = vld [vmem:[%s1762_s3] sm:$0xff] }
0x10dd   :  { %v1006_v52 = vsub.f32 1.0, %v1005_v10  ;;  %v1107_v10 = vld [vmem:[%s1762_s3 + $0x8] sm:$0xff] }
0x10de   :  { %1303 = vrcp.f32 %v966_v53  ;;  %v978_v35 = vand.u32 2147483648, %v966_v53  ;;  %vm972_vm1 = vweird.f32 %v966_v53  ;;  %v976_v36 = vand.u32 2147483647, %v966_v53 }
0x10df   :  { %v1007_v54 = vmul.f32 %v1300_v48, %v1006_v52 }
0x10e0   :  { %v979_v37 = vor.u32 1.1754944e-38, %v978_v35  ;;  %vm977_vm3 = vcmp.eq.f32.partialorder %v976_v36, 8.507059e+37 }
0x10e1   :  { %v1008_v33 = vadd.f32 %v1300_v48, %v1007_v54 }
0x10e3   :  { %v1012_v34 = vsel %vm1011_vm14, %v1300_v48, %v1008_v33  ;;  %v1108_v48 = vld [vmem:[%s1762_s3 + $0x10] sm:$0xff]  ;;  %v1188_v33 = vld [vmem:[%s1763_s4] ss:$0 sm:$0xff] }
0x10e4   :  { %v1304_v50 = vpop.eup %1303  ;;  %v1017_v55 = vsel %vm1014_vm15, %v1016_v58, %v1012_v34  ;;  %1132 = vmatpush.msra.mxu0 %v1108_v48 }
0x10e5   :  { %v968_v61 = vmul.f32 %v1304_v50, %v966_v53  ;;  %vm973_vm0 = vweird.f32 %v1304_v50  ;;  %v1020_v41 = vmul.f32 %v1017_v55, %v1707_v12 }
0x10e6   :  { %vm974_vm2 = vmor %vm972_vm1, %vm973_vm0  ;;  %1133 = vmatpush.msra.mxu0 %v1107_v10 }
0x10e7   :  { %v969_v46 = vsub.f32 1.0, %v968_v61 }
0x10e8   :  { %1134 = vmatpush.msra.mxu0 %v1106_v49 }
0x10e9   :  { %v970_v0 = vmul.f32 %v1304_v50, %v969_v46 }
0x10eb   :  { %v971_v1 = vadd.f32 %v1304_v50, %v970_v0 }
0x10ed   :  { %v975_v2 = vsel %vm974_vm2, %v1304_v50, %v971_v1 }
0x10ee   :  { %v980_v39 = vsel %vm977_vm3, %v979_v37, %v975_v2 }
0x10ef   :  { %v983_v62 = vmul.f32 %v980_v39, %v1711_v16 }
0x112a   :  { %v1023_v59 = vpop.permute.xlu2 %1022 }
0x112b   :  { %v1025_v60 = vmul.f32 %v1023_v59, %v1017_v55 }
0x112d   :  { %1027 = vrot.lane.b32.xlu1 %v1025_v60, %s1377_s2 }
0x113e   :  { %v986_v38 = vpop.permute.xlu1 %985 }
0x113f   :  { %v988_v40 = vmul.f32 %v986_v38, %v980_v39 }
0x1141   :  { %990 = vrot.lane.b32.xlu0 %v988_v40, %s1377_s2 }
0x119f   :  { %v1028_v44 = vpop.permute.xlu1 %1027 }
0x11a0   :  { %v1030_v3 = vadd.f32 %v1028_v44, %v1020_v41 }
0x11a2   :  { %1305 = vtanh.f32 %v1030_v3 }
0x11a8   :  { %v1306_v4 = vpop.eup %1305 }
0x11a9   :  { %1033 = vrot.lane.b32.xlu0 %v1306_v4, %s1376_s7 }
0x11b3   :  { %v991_v5 = vpop.permute.xlu0 %990 }
0x11b4   :  { %v993_v6 = vadd.f32 %v991_v5, %v983_v62 }
0x11b6   :  { %1307 = vtanh.f32 %v993_v6 }
0x11bc   :  { %v1308_v63 = vpop.eup %1307 }
0x11bd   :  { %996 = vrot.lane.b32.xlu2 %v1308_v63, %s1376_s7 }
0x1217   :  { %v997_v7 = vpop.permute.xlu2 %996 }
0x1218   :  { %v999_v8 = vmul.f32 %v997_v7, %v980_v39 }
0x121a   :  { %1038 = vrot.lane.b32.xlu1 %v999_v8, %s1377_s2 }
0x121b   :  { %v1034_v9 = vpop.permute.xlu0 %1033 }
0x121c   :  { %v1036_v11 = vmul.f32 %v1034_v9, %v1017_v55 }
0x121e   :  { %1042 = vrot.lane.b32.xlu2 %v1036_v11, %s1376_s7 }
0x1278   :  { %v1043_v12 = vpop.permute.xlu2 %1042 }
0x128c   :  { %v1039_v13 = vpop.permute.xlu1 %1038 }
0x128d   :  { %v1045_v14 = vsel %vm141_vm4, %v1039_v13, %v1043_v12 }
0x128e   :  { %1176 = vmatmul.msk.f32.vlgmr.msrb.gmra.mxu3 %vm74_vm5, %v1045_v14 }
0x1311   :  { %v1066_v15 = vpop.f32.mrf.mxu3 }
0x1312   :  { %v1067_v16 = vadd.f32 %v1066_v15, %v1555_v51 }
0x1314   :  { %1309 = vtanh.f32 %v1067_v16  ;;  %v1177_v18 = vmul.f32 -1.442695, %v1067_v16 }
0x1316   :  { %1311 = vpow2.f32 %v1177_v18 }
0x131a   :  { %v1310_v17 = vpop.eup %1309 }
0x131b   :  { %1091 = vrot.lane.b32.xlu0 %v1310_v17, %s1376_s7 }
0x131c   :  { %v1312_v19 = vpop.eup %1311 }
0x131d   :  { %v1072_v20 = vadd.f32 1.0, %v1312_v19 }
0x131f   :  { %1313 = vrcp.f32 %v1072_v20  ;;  %v1084_v26 = vand.u32 2147483648, %v1072_v20  ;;  %vm1078_vm5 = vweird.f32 %v1072_v20  ;;  %v1082_v27 = vand.u32 2147483647, %v1072_v20 }
0x1321   :  { %v1085_v28 = vor.u32 1.1754944e-38, %v1084_v26  ;;  %vm1083_vm8 = vcmp.eq.f32.partialorder %v1082_v27, 8.507059e+37 }
0x1325   :  { %v1314_v22 = vpop.eup %1313 }
0x1326   :  { %v1074_v21 = vmul.f32 %v1314_v22, %v1072_v20  ;;  %vm1079_vm6 = vweird.f32 %v1314_v22 }
0x1327   :  { %vm1080_vm7 = vmor %vm1078_vm5, %vm1079_vm6 }
0x1328   :  { %v1075_v23 = vsub.f32 1.0, %v1074_v21 }
0x132a   :  { %v1076_v24 = vmul.f32 %v1314_v22, %v1075_v23 }
0x132c   :  { %v1077_v25 = vadd.f32 %v1314_v22, %v1076_v24 }
0x132e   :  { %v1081_v51 = vsel %vm1080_vm7, %v1314_v22, %v1077_v25 }
0x132f   :  { %v1086_v31 = vsel %vm1083_vm8, %v1085_v28, %v1081_v51 }
0x1330   :  { %v1089_v42 = vmul.f32 %v1086_v31, %v1030_v3 }
0x138d   :  { %v1092_v29 = vpop.permute.xlu0 %1091 }
0x138e   :  { %v1094_v32 = vmul.f32 %v1092_v29, %v1086_v31 }
0x1390   :  { %1096 = vrot.lane.b32.xlu1 %v1094_v32, %s1377_s2 }
0x1402   :  { %v1097_v30 = vpop.permute.xlu1 %1096 }
0x1403   :  { %v1099_v43 = vadd.f32 %v1097_v30, %v1089_v42 }
0x1405   :  { %1315 = vtanh.f32 %v1099_v43 }
0x140b   :  { %v1316_v45 = vpop.eup %1315 }
0x140c   :  { %1102 = vrot.lane.b32.xlu2 %v1316_v45, %s1376_s7 }
0x1466   :  { %v1103_v52 = vpop.permute.xlu2 %1102 }
0x1467   :  { %v1105_v53 = vmul.f32 %v1103_v52, %v1086_v31 }
0x1469   :  { %1115 = vrot.lane.b32.xlu0 %v1105_v53, %s1377_s2 }
0x14db   :  { %v1116_v54 = vpop.permute.xlu0 %1115 }
0x14dc   :  { %1178 = vmatmul.msk.f32.vlgmr.msra.gmra.mxu0 %vm141_vm4, %v1116_v54 }
0x1559   :  { %v1136_v56 = vpop.f32.mrf.mxu0 }
0x155a   :  { %v1137_v57 = vadd.f32 %v1188_v33, %v1136_v56 }
0x155c   :  { %1140 = vst.msk [vmem:[%s1764_s5] sm:$0xff] %vm1139_vm9, %v1137_v57 }
0x155d   :  { %1145 = vsyncpa [#allocation3], 1 }
0x155e   :  { %1146 = vsyncpa [#allocation5], 1 }

</bundles_post_ra>
